<compile_context>
chip_gen: v7x
topology: tpu7x:2x2x1
jax: 0.10.0
libtpu: 0.0.40
codegen_flags: <defaults>
</compile_context>

<pallas_src>
import functools

import jax
import jax.numpy as jnp
from jax.experimental import pallas as pl
from jax.experimental.pallas import tpu as pltpu


def _round_up(x, m):
    return ((x + m - 1) // m) * m


# ---------------------------------------------------------------------------
# Fused kernel: per-tap LayerNorm (over Cin) + conv-as-one-matmul + bias.
#   x_ref    : (t_r, Kh, Wc, Kw*Cin)   raw input taps (bf16 or f32)
#   g_ref    : (1, Cin)                LN gamma (f32)
#   b_ref    : (1, Cin)                LN beta  (f32)
#   w_ref    : (Kh*Kw*Cin, tn)         conv weights (bf16, Cout padded to 128-multiple)
#   bias_ref : (1, tn)                 conv bias (f32)
#   o_ref    : (t_r, Wc, tn)           output tile (f32, lane-dense)
#   xn_ref   : (t_r, Wc, Kh*Kw*Cin)    bf16 scratch: cached normalized taps
# ---------------------------------------------------------------------------
def _fused_ln_conv_kernel(x_ref, g_ref, b_ref, w_ref, bias_ref, o_ref, xn_ref, *,
                          eps, kh_taps, kw_taps, cin):
    t_r, _, wc, _ = x_ref.shape
    rows = t_r * wc
    n_taps = kh_taps * kw_taps

    # LayerNorm over Cin for every tap, once per row tile (only at the first Cout tile);
    # the bf16 result is cached in VMEM and reused by every Cout tile of this row tile.
    @pl.when(pl.program_id(1) == 0)
    def _layer_norm():
        gamma = g_ref[...]                                     # (1, Cin) f32
        beta = b_ref[...]
        for i_kh in range(kh_taps):                            # static unroll over taps
            for i_kw in range(kw_taps):
                x = x_ref[:, i_kh, :, i_kw * cin:(i_kw + 1) * cin].astype(jnp.float32)
                mean = jnp.mean(x, axis=-1, keepdims=True)     # stats stay in f32
                cent = x - mean
                var = jnp.mean(cent * cent, axis=-1, keepdims=True)
                xn = cent * jax.lax.rsqrt(var + eps) * gamma + beta
                t = i_kh * kw_taps + i_kw
                xn_ref[:, :, t * cin:(t + 1) * cin] = xn.astype(xn_ref.dtype)

    # Single MXU contraction: (rows, Kh*Kw*Cin) @ (Kh*Kw*Cin, tn), f32 accumulation.
    xn2 = xn_ref[...].reshape(rows, n_taps * cin)
    acc = jnp.dot(xn2, w_ref[...], preferred_element_type=jnp.float32)
    acc = acc + bias_ref[...]
    o_ref[...] = acc.reshape(t_r, wc, -1).astype(o_ref.dtype)


def fused_ln_conv(x5, gamma2, beta2, w2, bias2, *, cin, kh, kw, eps=1e-6):
    """x5: (R, Kh, Wc, Kw*Cin); w2: (Kh*Kw*Cin, Cout_pad) bf16; returns (R, Wc, Cout_pad) f32."""
    R, kh_, wc, kwcin = x5.shape
    tcin, cout_pad = w2.shape
    n_taps = kh * kw
    assert kh_ == kh and kwcin == kw * cin and tcin == n_taps * cin
    assert cout_pad % 128 == 0

    # --- VMEM-aware tile selection --------------------------------------------------
    try:
        vmem_cap = pltpu.get_tpu_info().vmem_capacity_bytes
    except Exception:                           # fall back to the smallest budget (v7x, 64 MiB)
        vmem_cap = 64 * 1024 * 1024
    big_vmem = vmem_cap >= 100 * 1024 * 1024
    rows_target = 1024 if big_vmem else 512      # output rows per grid step
    t_r = max(1, min(R, rows_target // max(1, wc)))

    # Collapse the Cout grid axis when the whole weight panel comfortably fits in VMEM, so
    # weights are fetched once and stay resident; otherwise tile Cout and reuse the cached
    # normalized activations from the scratch (no LN recompute across Cout tiles).
    w_bytes = tcin * cout_pad * 2
    if w_bytes <= (8 if big_vmem else 4) * 1024 * 1024:
        tn = cout_pad
    elif cout_pad % 256 == 0:
        tn = 256
    else:
        tn = 128

    grid = (pl.cdiv(R, t_r), cout_pad // tn)     # cdiv grid: boundary blocks are masked,
                                                 # garbage boundary rows stay finite (eps > 0)
                                                 # and their stores are dropped.

    flops = 2 * R * wc * tcin * cout_pad
    bytes_accessed = (x5.size * x5.dtype.itemsize + tcin * cout_pad * 2
                      + R * wc * cout_pad * 4 + (2 * cin + 2 * cout_pad) * 4)
    transcendentals = R * wc * n_taps            # one rsqrt per (output row, tap)

    return pl.pallas_call(
        functools.partial(_fused_ln_conv_kernel, eps=eps, kh_taps=kh, kw_taps=kw, cin=cin),
        out_shape=jax.ShapeDtypeStruct((R, wc, cout_pad), jnp.float32),
        grid_spec=pltpu.PrefetchScalarGridSpec(
            num_scalar_prefetch=0,
            grid=grid,
            in_specs=[
                pl.BlockSpec((t_r, kh, wc, kwcin), lambda i, j: (i, 0, 0, 0)),
                pl.BlockSpec((1, cin), lambda i, j: (0, 0)),
                pl.BlockSpec((1, cin), lambda i, j: (0, 0)),
                pl.BlockSpec((tcin, tn), lambda i, j: (0, j)),
                pl.BlockSpec((1, tn), lambda i, j: (0, j)),
            ],
            out_specs=pl.BlockSpec((t_r, wc, tn), lambda i, j: (i, 0, j)),
            scratch_shapes=[pltpu.VMEM((t_r, wc, n_taps * cin), jnp.bfloat16)],
        ),
        compiler_params=pltpu.CompilerParams(
            dimension_semantics=("parallel", "arbitrary"),
            vmem_limit_bytes=min(int(vmem_cap * 3 // 4), 96 * 1024 * 1024),
        ),
        cost_estimate=pl.CostEstimate(
            flops=flops, transcendentals=transcendentals, bytes_accessed=bytes_accessed),
    )(x5, gamma2, beta2, w2, bias2)


# ---------------------------------------------------------------------------
# Full DownSampleLayer forward (LayerNorm -> strided conv, dense-grid semantics, NHWC).
# ---------------------------------------------------------------------------
def downsample_layer_forward(x_nhwc, prep, *, kernel_size, stride, out_channels):
    """x_nhwc: (N, H, W, Cin) channels-last.  Returns (N, Hout, Wout, out_channels)."""
    N, H, W, Cin = x_nhwc.shape
    Kh = Kw = kernel_size
    Hout = (H - Kh) // stride + 1
    Wout = (W - Kw) // stride + 1

    if stride == kernel_size and H == Hout * Kh and W == Wout * Kw:
        # Non-overlapping taps: copy-free space-to-depth *view* (pure dim split of a
        # row-major NHWC array); taps land on the lane axis as [kw, c] chunks.
        x5 = x_nhwc.reshape(N * Hout, Kh, Wout, Kw * Cin)
    else:
        # TODO(synk): general overlapping-stride fallback materializes an im2col copy in HBM.
        rows = []
        for i_kh in range(Kh):
            cols = [x_nhwc[:, i_kh:i_kh + stride * Hout:stride,
                           i_kw:i_kw + stride * Wout:stride, :] for i_kw in range(Kw)]
            rows.append(jnp.concatenate(cols, axis=-1))          # (N, Hout, Wout, Kw*Cin)
        x5 = jnp.stack(rows, axis=3).reshape(N * Hout * Wout, Kh, 1, Kw * Cin)

    out3 = fused_ln_conv(x5, prep["ln_gamma"], prep["ln_beta"], prep["conv_w2"],
                         prep["conv_b2"], cin=Cin, kh=Kh, kw=Kw, eps=1e-6)
    out = out3.reshape(N, Hout, Wout, -1)                        # free reshape (adjacent dims)
    if out.shape[-1] != out_channels:
        out = out[..., :out_channels]
    return out


def init_params(key, in_channels, out_channels, kernel_size):
    k1, k2 = jax.random.split(key)
    fan_in = in_channels * kernel_size * kernel_size
    scale = 1.0 / jnp.sqrt(jnp.float32(fan_in))
    return {
        "ln_gamma": jnp.ones((in_channels,), jnp.float32),
        "ln_beta": jnp.zeros((in_channels,), jnp.float32),
        "conv_w": scale * jax.random.normal(
            k1, (out_channels, in_channels, kernel_size, kernel_size), jnp.float32),
        "conv_b": scale * jax.random.normal(k2, (out_channels,), jnp.float32),
    }


def prepare_params(params):
    """One-time parameter prep (hoisted out of the per-forward path):
    tap-major weight flatten, lane-dense Cout padding, bf16 cast, LN param reshape."""
    w = params["conv_w"]                                        # (Cout, Cin, Kh, Kw)
    Cout, Cin, Kh, Kw = w.shape
    cout_pad = _round_up(Cout, 128)
    # (Cout, Cin, Kh, Kw) -> (Kh, Kw, Cin, Cout) -> (Kh*Kw*Cin, Cout): kh-major, kw, then Cin,
    # matching the lane order of the in-kernel tap concatenation.
    w2 = jnp.transpose(w, (2, 3, 1, 0)).reshape(Kh * Kw * Cin, Cout)
    bias = params["conv_b"]
    if cout_pad != Cout:
        w2 = jnp.pad(w2, ((0, 0), (0, cout_pad - Cout)))
        bias = jnp.pad(bias, ((0, cout_pad - Cout),))
    return {
        "ln_gamma": params["ln_gamma"].reshape(1, Cin).astype(jnp.float32),
        "ln_beta": params["ln_beta"].reshape(1, Cin).astype(jnp.float32),
        "conv_w2": w2.astype(jnp.bfloat16),
        "conv_b2": bias.reshape(1, cout_pad).astype(jnp.float32),
    }


def _reference_forward(x_nhwc, params, *, kernel_size, stride, eps=1e-6):
    """Pure-JAX (XLA) reference: LN over channels, then strided valid conv + bias (NHWC)."""
    x = x_nhwc.astype(jnp.float32)
    mean = jnp.mean(x, axis=-1, keepdims=True)
    var = jnp.mean((x - mean) ** 2, axis=-1, keepdims=True)
    xn = (x - mean) * jax.lax.rsqrt(var + eps) * params["ln_gamma"] + params["ln_beta"]
    out = jax.lax.conv_general_dilated(
        xn, jnp.transpose(params["conv_w"], (2, 3, 1, 0)),      # OIHW -> HWIO
        window_strides=(stride, stride), padding="VALID",
        dimension_numbers=("NHWC", "HWIO", "NHWC"))
    return out + params["conv_b"]


if __name__ == "__main__":
    key = jax.random.PRNGKey(0)
    kx, kp = jax.random.split(key)

    N, Cin, H, W = 2, 4, 16, 16
    Cout, ksize, stride = 8, 2, 2

    # Production path keeps activations NHWC + bf16 end-to-end; the kernel upcasts to f32
    # only for the LayerNorm statistics and the accumulator.
    x = jax.random.normal(kx, (N, H, W, Cin), jnp.float32).astype(jnp.bfloat16)
    params = init_params(kp, Cin, Cout, ksize)
    prep = prepare_params(params)               # hoisted: not part of the per-forward path

    fwd = jax.jit(functools.partial(downsample_layer_forward,
                                    kernel_size=ksize, stride=stride, out_channels=Cout))
    out = jax.block_until_ready(fwd(x, prep))
    assert out.shape == (N, H // stride, W // stride, Cout), out.shape

    ref = jax.block_until_ready(
        _reference_forward(x, params, kernel_size=ksize, stride=stride))
    max_err = float(jnp.max(jnp.abs(out.astype(jnp.float32) - ref)))
    # Tolerance covers the intentional bf16 MXU operands (~1e-3 relative error).
    assert max_err < 1e-1, f"max abs error vs reference too large: {max_err}"

    print("KERNEL_OK")
</pallas_src>

<mosaic_0001>
module attributes {stable_mosaic.version = 11 : i64} {
  func.func @_fused_ln_conv_kernel(%arg0: i32, %arg1: i32, %arg2: memref<16x2x8x8xbf16, #tpu.memory_space<vmem>>, %arg3: memref<1x4xf32, #tpu.memory_space<vmem>>, %arg4: memref<1x4xf32, #tpu.memory_space<vmem>>, %arg5: memref<16x128xbf16, #tpu.memory_space<vmem>>, %arg6: memref<1x128xf32, #tpu.memory_space<vmem>>, %arg7: memref<16x8x128xf32, #tpu.memory_space<vmem>>, %arg8: memref<16x8x16xbf16, #tpu.memory_space<vmem>>) attributes {dimension_semantics = [#tpu.dimension_semantics<parallel>, #tpu.dimension_semantics<arbitrary>], iteration_bounds = array<i64: 1, 1>, scalar_prefetch = 0 : i64, scratch_operands = 1 : i64, tpu.core_type = #tpu.core_type<tc>, window_params = [{transform_indices = @transform_0, window_bounds = array<i64: 16, 2, 8, 8>}, {pipeline_mode = #tpu.pipeline_mode<synchronous>, transform_indices = @transform_1, window_bounds = array<i64: 1, 4>}, {pipeline_mode = #tpu.pipeline_mode<synchronous>, transform_indices = @transform_2, window_bounds = array<i64: 1, 4>}, {transform_indices = @transform_3, window_bounds = array<i64: 16, 128>}, {transform_indices = @transform_4, window_bounds = array<i64: 1, 128>}, {transform_indices = @transform_5, window_bounds = array<i64: 16, 8, 128>}]} {
    %c0_i32 = arith.constant 0 : i32
    %0 = arith.cmpi eq, %arg1, %c0_i32 : i32
    %1 = arith.extui %0 : i1 to i32
    %c0_i32_0 = arith.constant 0 : i32
    %2 = arith.cmpi ne, %1, %c0_i32_0 : i32
    scf.if %2 {
      %c0_10 = arith.constant 0 : index
      %c0_11 = arith.constant 0 : index
      %12 = vector.load %arg3[%c0_10, %c0_11] : memref<1x4xf32, #tpu.memory_space<vmem>>, vector<1x4xf32>
      %c0_12 = arith.constant 0 : index
      %c0_13 = arith.constant 0 : index
      %13 = vector.load %arg4[%c0_12, %c0_13] : memref<1x4xf32, #tpu.memory_space<vmem>>, vector<1x4xf32>
      %c0_14 = arith.constant 0 : index
      %c0_15 = arith.constant 0 : index
      %c0_16 = arith.constant 0 : index
      %c0_17 = arith.constant 0 : index
      %14 = vector.load %arg2[%c0_14, %c0_15, %c0_16, %c0_17] : memref<16x2x8x8xbf16, #tpu.memory_space<vmem>>, vector<16x1x8x4xbf16>
      %15 = vector.shape_cast %14 : vector<16x1x8x4xbf16> to vector<16x8x4xbf16>
      %16 = arith.extf %15 : vector<16x8x4xbf16> to vector<16x8x4xf32>
      %cst_18 = arith.constant dense<0.000000e+00> : vector<16x8xf32>
      %17 = vector.multi_reduction <add>, %16, %cst_18 [2] : vector<16x8x4xf32> to vector<16x8xf32>
      %18 = vector.shape_cast %17 : vector<16x8xf32> to vector<16x8x1xf32>
      %cst_19 = arith.constant 4.000000e+00 : f32
      %19 = vector.broadcast %cst_19 : f32 to vector<16x8x1xf32>
      %20 = arith.divf %18, %19 : vector<16x8x1xf32>
      %21 = vector.broadcast %20 : vector<16x8x1xf32> to vector<16x8x4xf32>
      %22 = arith.subf %16, %21 : vector<16x8x4xf32>
      %23 = arith.mulf %22, %22 : vector<16x8x4xf32>
      %cst_20 = arith.constant dense<0.000000e+00> : vector<16x8xf32>
      %24 = vector.multi_reduction <add>, %23, %cst_20 [2] : vector<16x8x4xf32> to vector<16x8xf32>
      %25 = vector.shape_cast %24 : vector<16x8xf32> to vector<16x8x1xf32>
      %cst_21 = arith.constant 4.000000e+00 : f32
      %26 = vector.broadcast %cst_21 : f32 to vector<16x8x1xf32>
      %27 = arith.divf %25, %26 : vector<16x8x1xf32>
      %cst_22 = arith.constant 9.99999997E-7 : f32
      %28 = vector.broadcast %cst_22 : f32 to vector<16x8x1xf32>
      %29 = arith.addf %27, %28 : vector<16x8x1xf32>
      %30 = math.rsqrt %29 : vector<16x8x1xf32>
      %31 = vector.broadcast %30 : vector<16x8x1xf32> to vector<16x8x4xf32>
      %32 = arith.mulf %22, %31 : vector<16x8x4xf32>
      %33 = vector.shape_cast %12 : vector<1x4xf32> to vector<1x1x4xf32>
      %34 = vector.broadcast %33 : vector<1x1x4xf32> to vector<16x8x4xf32>
      %35 = arith.mulf %32, %34 : vector<16x8x4xf32>
      %36 = vector.shape_cast %13 : vector<1x4xf32> to vector<1x1x4xf32>
      %37 = vector.broadcast %36 : vector<1x1x4xf32> to vector<16x8x4xf32>
      %38 = arith.addf %35, %37 : vector<16x8x4xf32>
      %39 = arith.truncf %38 : vector<16x8x4xf32> to vector<16x8x4xbf16>
      %c0_23 = arith.constant 0 : index
      %c0_24 = arith.constant 0 : index
      %c0_25 = arith.constant 0 : index
      %40 = vector.load %arg8[%c0_23, %c0_24, %c0_25] : memref<16x8x16xbf16, #tpu.memory_space<vmem>>, vector<16x8x4xbf16>
      tpu.vector_store %arg8[%c0_23, %c0_24, %c0_25], %39 {strides = array<i32>} : memref<16x8x16xbf16, #tpu.memory_space<vmem>>, vector<16x8x4xbf16>,
      %c0_26 = arith.constant 0 : index
      %c0_27 = arith.constant 0 : index
      %c0_28 = arith.constant 0 : index
      %c4 = arith.constant 4 : index
      %41 = vector.load %arg2[%c0_26, %c0_27, %c0_28, %c4] : memref<16x2x8x8xbf16, #tpu.memory_space<vmem>>, vector<16x1x8x4xbf16>
      %42 = vector.shape_cast %41 : vector<16x1x8x4xbf16> to vector<16x8x4xbf16>
      %43 = arith.extf %42 : vector<16x8x4xbf16> to vector<16x8x4xf32>
      %cst_29 = arith.constant dense<0.000000e+00> : vector<16x8xf32>
      %44 = vector.multi_reduction <add>, %43, %cst_29 [2] : vector<16x8x4xf32> to vector<16x8xf32>
      %45 = vector.shape_cast %44 : vector<16x8xf32> to vector<16x8x1xf32>
      %cst_30 = arith.constant 4.000000e+00 : f32
      %46 = vector.broadcast %cst_30 : f32 to vector<16x8x1xf32>
      %47 = arith.divf %45, %46 : vector<16x8x1xf32>
      %48 = vector.broadcast %47 : vector<16x8x1xf32> to vector<16x8x4xf32>
      %49 = arith.subf %43, %48 : vector<16x8x4xf32>
      %50 = arith.mulf %49, %49 : vector<16x8x4xf32>
      %cst_31 = arith.constant dense<0.000000e+00> : vector<16x8xf32>
      %51 = vector.multi_reduction <add>, %50, %cst_31 [2] : vector<16x8x4xf32> to vector<16x8xf32>
      %52 = vector.shape_cast %51 : vector<16x8xf32> to vector<16x8x1xf32>
      %cst_32 = arith.constant 4.000000e+00 : f32
      %53 = vector.broadcast %cst_32 : f32 to vector<16x8x1xf32>
      %54 = arith.divf %52, %53 : vector<16x8x1xf32>
      %cst_33 = arith.constant 9.99999997E-7 : f32
      %55 = vector.broadcast %cst_33 : f32 to vector<16x8x1xf32>
      %56 = arith.addf %54, %55 : vector<16x8x1xf32>
      %57 = math.rsqrt %56 : vector<16x8x1xf32>
      %58 = vector.broadcast %57 : vector<16x8x1xf32> to vector<16x8x4xf32>
      %59 = arith.mulf %49, %58 : vector<16x8x4xf32>
      %60 = vector.shape_cast %12 : vector<1x4xf32> to vector<1x1x4xf32>
      %61 = vector.broadcast %60 : vector<1x1x4xf32> to vector<16x8x4xf32>
      %62 = arith.mulf %59, %61 : vector<16x8x4xf32>
      %63 = vector.shape_cast %13 : vector<1x4xf32> to vector<1x1x4xf32>
      %64 = vector.broadcast %63 : vector<1x1x4xf32> to vector<16x8x4xf32>
      %65 = arith.addf %62, %64 : vector<16x8x4xf32>
      %66 = arith.truncf %65 : vector<16x8x4xf32> to vector<16x8x4xbf16>
      %c0_34 = arith.constant 0 : index
      %c0_35 = arith.constant 0 : index
      %c4_36 = arith.constant 4 : index
      %67 = vector.load %arg8[%c0_34, %c0_35, %c4_36] : memref<16x8x16xbf16, #tpu.memory_space<vmem>>, vector<16x8x4xbf16>
      tpu.vector_store %arg8[%c0_34, %c0_35, %c4_36], %66 {strides = array<i32>} : memref<16x8x16xbf16, #tpu.memory_space<vmem>>, vector<16x8x4xbf16>,
      %c0_37 = arith.constant 0 : index
      %c1 = arith.constant 1 : index
      %c0_38 = arith.constant 0 : index
      %c0_39 = arith.constant 0 : index
      %68 = vector.load %arg2[%c0_37, %c1, %c0_38, %c0_39] : memref<16x2x8x8xbf16, #tpu.memory_space<vmem>>, vector<16x1x8x4xbf16>
      %69 = vector.shape_cast %68 : vector<16x1x8x4xbf16> to vector<16x8x4xbf16>
      %70 = arith.extf %69 : vector<16x8x4xbf16> to vector<16x8x4xf32>
      %cst_40 = arith.constant dense<0.000000e+00> : vector<16x8xf32>
      %71 = vector.multi_reduction <add>, %70, %cst_40 [2] : vector<16x8x4xf32> to vector<16x8xf32>
      %72 = vector.shape_cast %71 : vector<16x8xf32> to vector<16x8x1xf32>
      %cst_41 = arith.constant 4.000000e+00 : f32
      %73 = vector.broadcast %cst_41 : f32 to vector<16x8x1xf32>
      %74 = arith.divf %72, %73 : vector<16x8x1xf32>
      %75 = vector.broadcast %74 : vector<16x8x1xf32> to vector<16x8x4xf32>
      %76 = arith.subf %70, %75 : vector<16x8x4xf32>
      %77 = arith.mulf %76, %76 : vector<16x8x4xf32>
      %cst_42 = arith.constant dense<0.000000e+00> : vector<16x8xf32>
      %78 = vector.multi_reduction <add>, %77, %cst_42 [2] : vector<16x8x4xf32> to vector<16x8xf32>
      %79 = vector.shape_cast %78 : vector<16x8xf32> to vector<16x8x1xf32>
      %cst_43 = arith.constant 4.000000e+00 : f32
      %80 = vector.broadcast %cst_43 : f32 to vector<16x8x1xf32>
      %81 = arith.divf %79, %80 : vector<16x8x1xf32>
      %cst_44 = arith.constant 9.99999997E-7 : f32
      %82 = vector.broadcast %cst_44 : f32 to vector<16x8x1xf32>
      %83 = arith.addf %81, %82 : vector<16x8x1xf32>
      %84 = math.rsqrt %83 : vector<16x8x1xf32>
      %85 = vector.broadcast %84 : vector<16x8x1xf32> to vector<16x8x4xf32>
      %86 = arith.mulf %76, %85 : vector<16x8x4xf32>
      %87 = vector.shape_cast %12 : vector<1x4xf32> to vector<1x1x4xf32>
      %88 = vector.broadcast %87 : vector<1x1x4xf32> to vector<16x8x4xf32>
      %89 = arith.mulf %86, %88 : vector<16x8x4xf32>
      %90 = vector.shape_cast %13 : vector<1x4xf32> to vector<1x1x4xf32>
      %91 = vector.broadcast %90 : vector<1x1x4xf32> to vector<16x8x4xf32>
      %92 = arith.addf %89, %91 : vector<16x8x4xf32>
      %93 = arith.truncf %92 : vector<16x8x4xf32> to vector<16x8x4xbf16>
      %c0_45 = arith.constant 0 : index
      %c0_46 = arith.constant 0 : index
      %c8 = arith.constant 8 : index
      %94 = vector.load %arg8[%c0_45, %c0_46, %c8] : memref<16x8x16xbf16, #tpu.memory_space<vmem>>, vector<16x8x4xbf16>
      tpu.vector_store %arg8[%c0_45, %c0_46, %c8], %93 {strides = array<i32>} : memref<16x8x16xbf16, #tpu.memory_space<vmem>>, vector<16x8x4xbf16>,
      %c0_47 = arith.constant 0 : index
      %c1_48 = arith.constant 1 : index
      %c0_49 = arith.constant 0 : index
      %c4_50 = arith.constant 4 : index
      %95 = vector.load %arg2[%c0_47, %c1_48, %c0_49, %c4_50] : memref<16x2x8x8xbf16, #tpu.memory_space<vmem>>, vector<16x1x8x4xbf16>
      %96 = vector.shape_cast %95 : vector<16x1x8x4xbf16> to vector<16x8x4xbf16>
      %97 = arith.extf %96 : vector<16x8x4xbf16> to vector<16x8x4xf32>
      %cst_51 = arith.constant dense<0.000000e+00> : vector<16x8xf32>
      %98 = vector.multi_reduction <add>, %97, %cst_51 [2] : vector<16x8x4xf32> to vector<16x8xf32>
      %99 = vector.shape_cast %98 : vector<16x8xf32> to vector<16x8x1xf32>
      %cst_52 = arith.constant 4.000000e+00 : f32
      %100 = vector.broadcast %cst_52 : f32 to vector<16x8x1xf32>
      %101 = arith.divf %99, %100 : vector<16x8x1xf32>
      %102 = vector.broadcast %101 : vector<16x8x1xf32> to vector<16x8x4xf32>
      %103 = arith.subf %97, %102 : vector<16x8x4xf32>
      %104 = arith.mulf %103, %103 : vector<16x8x4xf32>
      %cst_53 = arith.constant dense<0.000000e+00> : vector<16x8xf32>
      %105 = vector.multi_reduction <add>, %104, %cst_53 [2] : vector<16x8x4xf32> to vector<16x8xf32>
      %106 = vector.shape_cast %105 : vector<16x8xf32> to vector<16x8x1xf32>
      %cst_54 = arith.constant 4.000000e+00 : f32
      %107 = vector.broadcast %cst_54 : f32 to vector<16x8x1xf32>
      %108 = arith.divf %106, %107 : vector<16x8x1xf32>
      %cst_55 = arith.constant 9.99999997E-7 : f32
      %109 = vector.broadcast %cst_55 : f32 to vector<16x8x1xf32>
      %110 = arith.addf %108, %109 : vector<16x8x1xf32>
      %111 = math.rsqrt %110 : vector<16x8x1xf32>
      %112 = vector.broadcast %111 : vector<16x8x1xf32> to vector<16x8x4xf32>
      %113 = arith.mulf %103, %112 : vector<16x8x4xf32>
      %114 = vector.shape_cast %12 : vector<1x4xf32> to vector<1x1x4xf32>
      %115 = vector.broadcast %114 : vector<1x1x4xf32> to vector<16x8x4xf32>
      %116 = arith.mulf %113, %115 : vector<16x8x4xf32>
      %117 = vector.shape_cast %13 : vector<1x4xf32> to vector<1x1x4xf32>
      %118 = vector.broadcast %117 : vector<1x1x4xf32> to vector<16x8x4xf32>
      %119 = arith.addf %116, %118 : vector<16x8x4xf32>
      %120 = arith.truncf %119 : vector<16x8x4xf32> to vector<16x8x4xbf16>
      %c0_56 = arith.constant 0 : index
      %c0_57 = arith.constant 0 : index
      %c12 = arith.constant 12 : index
      %121 = vector.load %arg8[%c0_56, %c0_57, %c12] : memref<16x8x16xbf16, #tpu.memory_space<vmem>>, vector<16x8x4xbf16>
      tpu.vector_store %arg8[%c0_56, %c0_57, %c12], %120 {strides = array<i32>} : memref<16x8x16xbf16, #tpu.memory_space<vmem>>, vector<16x8x4xbf16>,
    } else {
    }
    %c0 = arith.constant 0 : index
    %c0_1 = arith.constant 0 : index
    %c0_2 = arith.constant 0 : index
    %3 = vector.load %arg8[%c0, %c0_1, %c0_2] : memref<16x8x16xbf16, #tpu.memory_space<vmem>>, vector<16x8x16xbf16>
    %4 = vector.shape_cast %3 : vector<16x8x16xbf16> to vector<128x16xbf16>
    %c0_3 = arith.constant 0 : index
    %c0_4 = arith.constant 0 : index
    %5 = vector.load %arg5[%c0_3, %c0_4] : memref<16x128xbf16, #tpu.memory_space<vmem>>, vector<16x128xbf16>
    %cst = arith.constant dense<0.000000e+00> : vector<128x128xf32>
    %6 = tpu.matmul %4, %5, %cst {dimension_numbers = #tpu.dot_dimension_numbers<[1], [0], [0], [1], [0, 0, 1, 1], [], []>} : vector<128x16xbf16>, vector<16x128xbf16>, vector<128x128xf32> -> vector<128x128xf32>
    %c0_5 = arith.constant 0 : index
    %c0_6 = arith.constant 0 : index
    %7 = vector.load %arg6[%c0_5, %c0_6] : memref<1x128xf32, #tpu.memory_space<vmem>>, vector<1x128xf32>
    %8 = vector.broadcast %7 : vector<1x128xf32> to vector<128x128xf32>
    %9 = arith.addf %6, %8 : vector<128x128xf32>
    %10 = vector.shape_cast %9 : vector<128x128xf32> to vector<16x8x128xf32>
    %c0_7 = arith.constant 0 : index
    %c0_8 = arith.constant 0 : index
    %c0_9 = arith.constant 0 : index
    %11 = vector.load %arg7[%c0_7, %c0_8, %c0_9] : memref<16x8x128xf32, #tpu.memory_space<vmem>>, vector<16x8x128xf32>
    tpu.vector_store %arg7[%c0_7, %c0_8, %c0_9], %10 {strides = array<i32>} : memref<16x8x128xf32, #tpu.memory_space<vmem>>, vector<16x8x128xf32>,
    return
  }
  func.func @transform_0(%arg0: i32, %arg1: i32) -> (i32, i32, i32, i32) {
    %c0_i32 = arith.constant 0 : i32
    %c0_i32_0 = arith.constant 0 : i32
    %c0_i32_1 = arith.constant 0 : i32
    %c0_i32_2 = arith.constant 0 : i32
    return %arg0, %c0_i32, %c0_i32_0, %c0_i32_1 : i32, i32, i32, i32
  }
  func.func @transform_1(%arg0: i32, %arg1: i32) -> (i32, i32) {
    %c0_i32 = arith.constant 0 : i32
    %c0_i32_0 = arith.constant 0 : i32
    %c0_i32_1 = arith.constant 0 : i32
    return %c0_i32, %c0_i32_0 : i32, i32
  }
  func.func @transform_2(%arg0: i32, %arg1: i32) -> (i32, i32) {
    %c0_i32 = arith.constant 0 : i32
    %c0_i32_0 = arith.constant 0 : i32
    %c0_i32_1 = arith.constant 0 : i32
    return %c0_i32, %c0_i32_0 : i32, i32
  }
  func.func @transform_3(%arg0: i32, %arg1: i32) -> (i32, i32) {
    %c0_i32 = arith.constant 0 : i32
    %c0_i32_0 = arith.constant 0 : i32
    return %c0_i32, %arg1 : i32, i32
  }
  func.func @transform_4(%arg0: i32, %arg1: i32) -> (i32, i32) {
    %c0_i32 = arith.constant 0 : i32
    %c0_i32_0 = arith.constant 0 : i32
    return %c0_i32, %arg1 : i32, i32
  }
  func.func @transform_5(%arg0: i32, %arg1: i32) -> (i32, i32, i32) {
    %c0_i32 = arith.constant 0 : i32
    %c0_i32_0 = arith.constant 0 : i32
    return %arg0, %c0_i32, %arg1 : i32, i32, i32
  }
}

</mosaic_0001>

<bundles_post_ra>
// kernel: downsample_layer_forward.1
= control target key start
LH: loop header
LB: loop body
LE: loop exit
PB: predicated region body
PF: predicated region fallthrough
CT: control target
= control target key end

     0   :  { %s2335_s17 = smov 124   ;;  %s3823_s0 = inlined_call_operand.vmem [shape: bf16[16,2,8,8], index: 0, kind: input, shape index: {}]   ;;  %s3824_s1 = inlined_call_operand.vmem [shape: f32[1,4], index: 1, kind: input, shape index: {}]   ;;  %s3825_s2 = inlined_call_operand.vmem [shape: f32[1,4], index: 2, kind: input, shape index: {}]   ;;  %s3826_s3 = inlined_call_operand.vmem [shape: bf16[16,128], index: 3, kind: input, shape index: {}]   ;;  %s3827_s4 = inlined_call_operand.vmem [shape: f32[1,128], index: 4, kind: input, shape index: {}]   ;;  %s3828_s5 = inlined_call_operand.hbm [shape: f32[16,8,128], index: 5, kind: output, shape index: {}]  }
   0x1   :  { %v2373_v0 = vld [vmem:[%s3823_s0 + $0x4] sm:$0xff]   ;;  %v2378_v1 = vld [vmem:[%s3823_s0 + $0xc] sm:$0xff]   ;;  %v2407_v10 = vld [vmem:[%s3823_s0 + $0x14] sm:$0xff]  }
   0x2   :  { %v2383_v2 = vld [vmem:[%s3823_s0 + $0x44] sm:$0xff]   ;;  %v1204_v3 = vunpack.c.l.bf16 %v2373_v0  ;;  %v1205_v4 = vunpack.c.l.bf16 %v2378_v1  ;;  %v2390_v5 = vld [vmem:[%s3823_s0 + $0x4c] sm:$0xff]   ;;  %v2412_v11 = vld [vmem:[%s3823_s0 + $0x1c] sm:$0xff]   ;;  %v1206_v13 = vunpack.c.l.bf16 %v2407_v10 }
   0x3   :  { %v1212_v6 = vunpack.c.l.bf16 %v2383_v2  ;;  %v2396_v7 = vld [vmem:[%s3823_s0 + $0x24] sm:$0xff]   ;;  %v1213_v8 = vunpack.c.l.bf16 %v2390_v5  ;;  %v2402_v9 = vld [vmem:[%s3823_s0 + $0x2c] sm:$0xff]   ;;  %v1207_v14 = vunpack.c.l.bf16 %v2412_v11  ;;  %v2423_v15 = vld [vmem:[%s3823_s0 + $0x54] sm:$0xff]  }
   0x4   :  { %v2092_v12 = vpack.i.bf16 %v1205_v4, %v1204_v3  ;;  %v2428_v16 = vld [vmem:[%s3823_s0 + $0x5c] sm:$0xff]   ;;  %v1208_v17 = vunpack.c.l.bf16 %v2396_v7  ;;  %v1214_v18 = vunpack.c.l.bf16 %v2423_v15  ;;  %v2435_v19 = vld [vmem:[%s3823_s0 + $0x64] sm:$0xff]   ;;  %v2440_v20 = vld [vmem:[%s3823_s0 + $0x6c] sm:$0xff]   ;;  %v1209_v22 = vunpack.c.l.bf16 %v2402_v9 }
   0x5   :  { %v2097_v21 = vpack.i.bf16 %v1213_v8, %v1212_v6  ;;  %v2102_v23 = vpack.i.bf16 %v1207_v14, %v1206_v13  ;;  %v2455_v24 = vld [vmem:[%s3823_s0 + $0x34] sm:$0xff]   ;;  %v1215_v25 = vunpack.c.l.bf16 %v2428_v16  ;;  %v2461_v26 = vld [vmem:[%s3823_s0 + $0x3c] sm:$0xff]  }
   0x6   :  { %2093 = vrot.lane.b32.xlu0 %v2092_v12, %s2335_s17 }
   0x7   :  { %10 = vsyncpa [#allocation4], 0  ;;  %2103 = vrot.lane.b32.xlu1 %v2102_v23, %s2335_s17  ;;  %v2107_v27 = vpack.i.bf16 %v1215_v25, %v1214_v18  ;;  %v1216_v28 = vunpack.c.l.bf16 %v2435_v19  ;;  %v1217_v29 = vunpack.c.l.bf16 %v2440_v20  ;;  %v2473_v30 = vld [vmem:[%s3823_s0 + $0x74] sm:$0xff]   ;;  %v2478_v31 = vld [vmem:[%s3823_s0] ss:$124 sps:$4 sm:$0xff]   ;;  %v2112_v32 = vpack.i.bf16 %v1209_v22, %v1208_v17  ;;  %s2336_s11 = smov 4  }
   0x8   :  { %v1210_v33 = vunpack.c.l.bf16 %v2455_v24  ;;  %v1211_v34 = vunpack.c.l.bf16 %v2461_v26  ;;  %v1218_v36 = vunpack.c.l.bf16 %v2473_v30  ;;  %v1219_v37 = vunpack.c.h.bf16 %v2478_v31  ;;  %v2497_v38 = vld [vmem:[%s3823_s0] sm:$0xff]   ;;  %s2337_s14 = smov 8  }
   0x9   :  { %v2117_v35 = vpack.i.bf16 %v1217_v29, %v1216_v28  ;;  %v3870_v41 = vunpack.c.l.bf16 %v2497_v38  ;;  %v3868_v42 = vunpack.c.h.bf16 %v2373_v0  ;;  %v3866_v44 = vunpack.c.h.bf16 %v2461_v26 }
   0xa   :  { %2098 = vrot.lane.b32.xlu0 %v2097_v21, %s2335_s17  ;;  %v2122_v39 = vpack.i.bf16 %v1211_v34, %v1210_v33  ;;  %v2127_v40 = vpack.i.bf16 %v1219_v37, %v1218_v36  ;;  %v3858_v45 = vunpack.c.h.bf16 %v2383_v2  ;;  %v3856_v47 = vunpack.c.h.bf16 %v2378_v1 }
   0xb   :  { %2108 = vrot.lane.b32.xlu1 %v2107_v27, %s2335_s17  ;;  %v2132_v43 = vpack.i.bf16 %v3868_v42, %v3870_v41  ;;  %v3854_v48 = vunpack.c.h.bf16 %v2407_v10  ;;  %v3852_v50 = vunpack.c.h.bf16 %v2390_v5  ;;  %v3850_v51 = vunpack.c.h.bf16 %v2423_v15 }
   0xc   :  { %v2137_v46 = vpack.i.bf16 %v3858_v45, %v3866_v44  ;;  %v3835_v53 = vunpack.c.h.bf16 %v2428_v16  ;;  %v3834_v54 = vunpack.c.h.bf16 %v2435_v19  ;;  %v3833_v56 = vunpack.c.h.bf16 %v2402_v9 }
   0xd   :  { %v2142_v49 = vpack.i.bf16 %v3854_v48, %v3856_v47  ;;  %v2147_v52 = vpack.i.bf16 %v3850_v51, %v3852_v50  ;;  %v3832_v57 = vunpack.c.h.bf16 %v2455_v24  ;;  %v3829_v59 = vunpack.c.l.bf16 %v2478_v31 }
   0xe   :  { %2113 = vrot.lane.b32.xlu0 %v2112_v32, %s2335_s17  ;;  %v2157_v55 = vpack.i.bf16 %v3834_v54, %v3835_v53  ;;  %vm60_vm0 = vcmask 31744   ;;  %v3837_v61 = vunpack.c.h.bf16 %v2412_v11  ;;  %v3836_v62 = vunpack.c.h.bf16 %v2396_v7 }
   0xf   :  { %2118 = vrot.lane.b32.xlu1 %v2117_v35, %s2335_s17  ;;  %v2162_v58 = vpack.i.bf16 %v3832_v57, %v3833_v56  ;;  %v61_v60 = vsel %vm60_vm0, %v3829_v59, 0.0  ;;  %v3831_v12 = vunpack.c.h.bf16 %v2440_v20  ;;  %v3830_v21 = vunpack.c.h.bf16 %v2473_v30 }
  0x10   :  { %v2152_v63 = vpack.i.bf16 %v3836_v62, %v3837_v61  ;;  %vm330_vm1 = vcmask 27648   ;;  %vm769_vm2 = vcmask 60448   ;;  %vm1171_vm3 = vcmask 93248  }
  0x11   :  { %v2167_v23 = vpack.i.bf16 %v3830_v21, %v3831_v12  ;;  %vm1700_vm4 = vcmask 126048   ;;  %vm1788_vm5 = vcmask 130048  }
  0x12   :  { %2123 = vrot.lane.b32.xlu0 %v2122_v39, %s2335_s17 }
  0x13   :  { %2128 = vrot.lane.b32.xlu1 %v2127_v40, %s2335_s17 }
  0x17   :  { %2133 = vrot.lane.b32.xlu1 %v2132_v43, %s2335_s17 }
  0x1b   :  { %2138 = vrot.lane.b32.xlu1 %v2137_v46, %s2335_s17 }
  0x1f   :  { %2143 = vrot.lane.b32.xlu1 %v2142_v49, %s2335_s17 }
  0x23   :  { %2148 = vrot.lane.b32.xlu1 %v2147_v52, %s2335_s17 }
  0x27   :  { %2158 = vrot.lane.b32.xlu1 %v2157_v55, %s2335_s17 }
  0x2b   :  { %2163 = vrot.lane.b32.xlu1 %v2162_v58, %s2335_s17 }
  0x31   :  { %62 = vadd.xlane.f32.xlu0 %v61_v60 }
  0x47   :  { %2153 = vrot.lane.b32.xlu0 %v2152_v63, %s2335_s17 }
  0x4b   :  { %2168 = vrot.lane.b32.xlu0 %v2167_v23, %s2335_s17 }
  0x78   :  { %v2094_v27 = vpop.permute.xlu0 %2093 }
  0x79   :  { %v2095_v32 = vunpack.i.l.bf16 %v2094_v27  ;;  %v2096_v35 = vunpack.i.h.bf16 %v2094_v27  ;;  %v2104_v39 = vpop.permute.xlu1 %2103 }
  0x7a   :  { %v2105_v23 = vunpack.i.l.bf16 %v2104_v39 }
  0x7b   :  { %v1284_v40 = vsel %vm60_vm0, %v2095_v32, 0.0  ;;  %v1287_v43 = vsel %vm60_vm0, %v2096_v35, 0.0 }
  0x7c   :  { %v2099_v46 = vpop.permute.xlu0 %2098  ;;  %1285 = vadd.xlane.f32.xlu1 %v1284_v40  ;;  %1288 = vadd.xlane.f32.xlu0 %v1287_v43  ;;  %v1290_v12 = vsel %vm60_vm0, %v2105_v23, 0.0 }
  0x7d   :  { %v2100_v49 = vunpack.i.l.bf16 %v2099_v46  ;;  %v2109_v52 = vpop.permute.xlu1 %2108  ;;  %v2101_v58 = vunpack.i.h.bf16 %v2099_v46 }
  0x7e   :  { %v2111_v60 = vunpack.i.h.bf16 %v2109_v52 }
  0x7f   :  { %v1308_v55 = vsel %vm60_vm0, %v2100_v49, 0.0  ;;  %v1311_v32 = vsel %vm60_vm0, %v2101_v58, 0.0  ;;  %v2106_v49 = vunpack.i.h.bf16 %v2104_v39 }
  0x80   :  { %1309 = vadd.xlane.f32.xlu0 %v1308_v55  ;;  %v2114_v63 = vpop.permute.xlu0 %2113  ;;  %v1317_v59 = vsel %vm60_vm0, %v2111_v60, 0.0  ;;  %v2110_v60 = vunpack.i.l.bf16 %v2109_v52 }
  0x81   :  { %v2115_v27 = vunpack.i.l.bf16 %v2114_v63  ;;  %1318 = vadd.xlane.f32.xlu1 %v1317_v59  ;;  %v2119_v21 = vpop.permute.xlu1 %2118  ;;  %v1293_v56 = vsel %vm60_vm0, %v2106_v49, 0.0  ;;  %v2116_v54 = vunpack.i.h.bf16 %v2114_v63 }
  0x82   :  { %v2121_v40 = vunpack.i.h.bf16 %v2119_v21  ;;  %v2120_v52 = vunpack.i.l.bf16 %v2119_v21 }
  0x83   :  { %v1296_v35 = vsel %vm60_vm0, %v2115_v27, 0.0 }
  0x84   :  { %1312 = vadd.xlane.f32.xlu0 %v1311_v32  ;;  %v2124_v43 = vpop.permute.xlu0 %2123  ;;  %v1323_v55 = vsel %vm60_vm0, %v2121_v40, 0.0  ;;  %v1314_v32 = vsel %vm60_vm0, %v2110_v60, 0.0 }
  0x85   :  { %1297 = vadd.xlane.f32.xlu1 %v1296_v35  ;;  %v2129_v46 = vpop.permute.xlu1 %2128  ;;  %v2126_v57 = vunpack.i.h.bf16 %v2124_v43 }
  0x86   :  { %v2131_v27 = vunpack.i.h.bf16 %v2129_v46 }
  0x87   :  { %v1305_v58 = vsel %vm60_vm0, %v2126_v57, 0.0  ;;  %v2125_v57 = vunpack.i.l.bf16 %v2124_v43 }
  0x88   :  { %1291 = vadd.xlane.f32.xlu0 %v1290_v12  ;;  %v1329_v39 = vsel %vm60_vm0, %v2131_v27, 0.0  ;;  %v1299_v12 = vsel %vm60_vm0, %v2116_v54, 0.0  ;;  %v2130_v27 = vunpack.i.l.bf16 %v2129_v46 }
  0x89   :  { %1324 = vadd.xlane.f32.xlu1 %v1323_v55  ;;  %v2134_v59 = vpop.permute.xlu1 %2133  ;;  %v1302_v54 = vsel %vm60_vm0, %v2125_v57, 0.0 }
  0x8a   :  { %v2136_v35 = vunpack.i.h.bf16 %v2134_v59  ;;  %v1326_v43 = vsel %vm60_vm0, %v2130_v27, 0.0 }
  0x8c   :  { %1294 = vadd.xlane.f32.xlu0 %v1293_v56  ;;  %v446_v49 = vsel %vm60_vm0, %v2136_v35, 0.0  ;;  %v1320_v56 = vsel %vm60_vm0, %v2120_v52, 0.0  ;;  %v2135_v35 = vunpack.i.l.bf16 %v2134_v59  ;;  %v2600_v52 = vld [vmem:[%s3823_s0 + $0x1c] ss:$48 sps:$4 sm:$0xff]  }
  0x8d   :  { %1306 = vadd.xlane.f32.xlu1 %v1305_v58  ;;  %v2139_v23 = vpop.permute.xlu1 %2138  ;;  %v3843_v59 = vunpack.c.h.bf16 %v2600_v52  ;;  %v3839_v27 = vunpack.c.l.bf16 %v2600_v52 }
  0x8e   :  { %v2141_v55 = vunpack.i.h.bf16 %v2139_v23 }
  0x90   :  { %1315 = vadd.xlane.f32.xlu0 %v1314_v32  ;;  %v470_v63 = vsel %vm60_vm0, %v2141_v55, 0.0  ;;  %v2140_v55 = vunpack.i.l.bf16 %v2139_v23  ;;  %v2615_v23 = vld [vmem:[%s3823_s0 + $0x10] ss:$76 sps:$4 sm:$0xff]  }
  0x91   :  { %1330 = vadd.xlane.f32.xlu1 %v1329_v39  ;;  %v2144_v40 = vpop.permute.xlu1 %2143  ;;  %v2592_v39 = vld [vmem:[%s3823_s0 + $0x8] sm:$0xff]  }
  0x92   :  { %v2146_v60 = vunpack.i.h.bf16 %v2144_v40  ;;  %v3842_v46 = vunpack.c.h.bf16 %v2592_v39  ;;  %v467_v57 = vsel %vm60_vm0, %v2140_v55, 0.0 }
  0x94   :  { %1300 = vadd.xlane.f32.xlu0 %v1299_v12  ;;  %v452_v21 = vsel %vm60_vm0, %v2146_v60, 0.0  ;;  %v846_v60 = vsel %vm60_vm0, %v3843_v59, 0.0 }
  0x95   :  { %447 = vadd.xlane.f32.xlu1 %v446_v49  ;;  %v2149_v58 = vpop.permute.xlu1 %2148  ;;  %v443_v49 = vsel %vm60_vm0, %v2135_v35, 0.0  ;;  %v3845_v35 = vunpack.c.h.bf16 %v2497_v38 }
  0x96   :  { %v2151_v32 = vunpack.i.h.bf16 %v2149_v58 }
  0x98   :  { %1321 = vadd.xlane.f32.xlu0 %v1320_v56  ;;  %v476_v12 = vsel %vm60_vm0, %v2151_v32, 0.0  ;;  %v822_v56 = vsel %vm60_vm0, %v3842_v46, 0.0  ;;  %v3838_v32 = vunpack.c.h.bf16 %v2615_v23 }
  0x99   :  { %471 = vadd.xlane.f32.xlu1 %v470_v63  ;;  %v2145_v63 = vunpack.i.l.bf16 %v2144_v40  ;;  %v828_v40 = vsel %vm60_vm0, %v3839_v27, 0.0 }
  0x9c   :  { %1303 = vadd.xlane.f32.xlu0 %v1302_v54  ;;  %v449_v54 = vsel %vm60_vm0, %v2145_v63, 0.0 }
  0x9d   :  { %453 = vadd.xlane.f32.xlu1 %v452_v21  ;;  %v2150_v21 = vunpack.i.l.bf16 %v2149_v58  ;;  %v852_v58 = vsel %vm60_vm0, %v3838_v32, 0.0 }
  0xa0   :  { %1327 = vadd.xlane.f32.xlu0 %v1326_v43  ;;  %v473_v43 = vsel %vm60_vm0, %v2150_v21, 0.0 }
  0xa1   :  { %477 = vadd.xlane.f32.xlu1 %v476_v12  ;;  %v2627_v12 = vld [vmem:[%s3823_s0 + $0x44] sm:$0xff]  }
  0xa2   :  { %v3844_v55 = vunpack.c.l.bf16 %v2627_v12 }
  0xa4   :  { %444 = vadd.xlane.f32.xlu0 %v443_v49  ;;  %v819_v49 = vsel %vm60_vm0, %v3845_v35, 0.0 }
  0xa5   :  { %823 = vadd.xlane.f32.xlu1 %v822_v56  ;;  %v2639_v56 = vld [vmem:[%s3823_s0 + $0x14] sm:$0xff]  }
  0xa6   :  { %v3840_v63 = vunpack.c.l.bf16 %v2639_v56 }
  0xa8   :  { %468 = vadd.xlane.f32.xlu0 %v467_v57  ;;  %v843_v57 = vsel %vm60_vm0, %v3844_v55, 0.0 }
  0xa9   :  { %847 = vadd.xlane.f32.xlu1 %v846_v60  ;;  %v2648_v60 = vld [vmem:[%s3823_s0 + $0x54] sm:$0xff]  }
  0xaa   :  { %v3841_v21 = vunpack.c.l.bf16 %v2648_v60 }
  0xac   :  { %450 = vadd.xlane.f32.xlu0 %v449_v54  ;;  %v825_v54 = vsel %vm60_vm0, %v3840_v63, 0.0 }
  0xad   :  { %829 = vadd.xlane.f32.xlu1 %v828_v40  ;;  %v849_v40 = vsel %vm60_vm0, %v3841_v21, 0.0 }
  0xb0   :  { %474 = vadd.xlane.f32.xlu0 %v473_v43 }
  0xb1   :  { %853 = vadd.xlane.f32.xlu1 %v852_v58  ;;  %v2159_v58 = vpop.permute.xlu1 %2158 }
  0xb2   :  { %v2161_v61 = vunpack.i.h.bf16 %v2159_v58 }
  0xb4   :  { %820 = vadd.xlane.f32.xlu0 %v819_v49 }
  0xb5   :  { %v2164_v32 = vpop.permute.xlu1 %2163 }
  0xb6   :  { %v2166_v46 = vunpack.i.h.bf16 %v2164_v32  ;;  %v2165_v59 = vunpack.i.l.bf16 %v2164_v32  ;;  %v2682_v32 = vld [vmem:[%s3823_s0 + $0x6c] sm:$0xff]  }
  0xb8   :  { %844 = vadd.xlane.f32.xlu0 %v843_v57  ;;  %v2160_v57 = vunpack.i.l.bf16 %v2159_v58  ;;  %v461_v58 = vsel %vm60_vm0, %v2165_v59, 0.0 }
  0xba   :  { %v479_v21 = vsel %vm60_vm0, %v2160_v57, 0.0 }
  0xbc   :  { %826 = vadd.xlane.f32.xlu0 %v825_v54  ;;  %v482_v54 = vsel %vm60_vm0, %v2161_v61, 0.0  ;;  %v2673_v61 = vld [vmem:[%s3823_s0 + $0x24] sm:$0xff]  }
  0xbe   :  { %v2657_v43 = vpop.xlane.xlu0 %62 }
  0xc0   :  { %850 = vadd.xlane.f32.xlu0 %v849_v40  ;;  %v464_v40 = vsel %vm60_vm0, %v2166_v46, 0.0 }
  0xc2   :  { %v2154_v49 = vpop.permute.xlu0 %2153 }
  0xc3   :  { %v2156_v53 = vunpack.i.h.bf16 %v2154_v49  ;;  %v2155_v62 = vunpack.i.l.bf16 %v2154_v49 }
  0xc5   :  { %v458_v27 = vsel %vm60_vm0, %v2156_v53, 0.0  ;;  %v455_v63 = vsel %vm60_vm0, %v2155_v62, 0.0  ;;  %v2668_v53 = vld [vmem:[%s3823_s0 + $0x2c] sm:$0xff]  }
  0xc6   :  { %459 = vadd.xlane.f32.xlu1 %v458_v27  ;;  %456 = vadd.xlane.f32.xlu0 %v455_v63  ;;  %v2169_v55 = vpop.permute.xlu0 %2168  ;;  %v3846_v59 = vunpack.c.l.bf16 %v2668_v53  ;;  %v3849_v27 = vunpack.c.l.bf16 %v2673_v61  ;;  %v3878_v42 = vunpack.c.h.bf16 %v2668_v53 }
  0xc7   :  { %v2171_v49 = vunpack.i.h.bf16 %v2169_v55  ;;  %v2170_v35 = vunpack.i.l.bf16 %v2169_v55  ;;  %v2687_v55 = vld [vmem:[%s3823_s0 + $0x64] sm:$0xff]  }
  0xc8   :  { %v831_v63 = vsel %vm60_vm0, %v3849_v27, 0.0  ;;  %v3848_v57 = vunpack.c.l.bf16 %v2687_v55 }
  0xc9   :  { %v488_v62 = vsel %vm60_vm0, %v2171_v49, 0.0  ;;  %v485_v46 = vsel %vm60_vm0, %v2170_v35, 0.0  ;;  %v834_v35 = vsel %vm60_vm0, %v3846_v59, 0.0  ;;  %v2718_v59 = vld [vmem:[%s3823_s0 + $0x50] ss:$44 sps:$4 sm:$0xff]  }
  0xca   :  { %483 = vadd.xlane.f32.xlu1 %v482_v54  ;;  %480 = vadd.xlane.f32.xlu0 %v479_v21  ;;  %v3847_v21 = vunpack.c.l.bf16 %v2682_v32  ;;  %v2700_v54 = vld [vmem:[%s3823_s0 + $0x3c] sm:$0xff]   ;;  %v855_v49 = vsel %vm60_vm0, %v3848_v57, 0.0  ;;  %v3855_v57 = vunpack.c.h.bf16 %v2718_v59 }
  0xcc   :  { %v864_v51 = vsel %vm60_vm0, %v3855_v57, 0.0 }
  0xce   :  { %465 = vadd.xlane.f32.xlu1 %v464_v40  ;;  %462 = vadd.xlane.f32.xlu0 %v461_v58  ;;  %v2705_v40 = vld [vmem:[%s3823_s0 + $0x34] sm:$0xff]   ;;  %v858_v58 = vsel %vm60_vm0, %v3847_v21, 0.0 }
  0xd2   :  { %489 = vadd.xlane.f32.xlu1 %v488_v62  ;;  %486 = vadd.xlane.f32.xlu0 %v485_v46  ;;  %v3851_v62 = vunpack.c.l.bf16 %v2700_v54  ;;  %v3853_v46 = vunpack.c.l.bf16 %v2705_v40 }
  0xd4   :  { %v837_v21 = vsel %vm60_vm0, %v3853_v46, 0.0 }
  0xd6   :  { %835 = vadd.xlane.f32.xlu1 %v834_v35  ;;  %832 = vadd.xlane.f32.xlu0 %v831_v63  ;;  %v2723_v35 = vld [vmem:[%s3823_s0 + $0x74] sm:$0xff]   ;;  %v840_v63 = vsel %vm60_vm0, %v3851_v62, 0.0 }
  0xd7   :  { %v3857_v27 = vunpack.c.l.bf16 %v2723_v35 }
  0xda   :  { %859 = vadd.xlane.f32.xlu1 %v858_v58  ;;  %856 = vadd.xlane.f32.xlu0 %v855_v49  ;;  %v861_v58 = vsel %vm60_vm0, %v3857_v27, 0.0 }
  0xde   :  { %841 = vadd.xlane.f32.xlu1 %v840_v63  ;;  %838 = vadd.xlane.f32.xlu0 %v837_v21 }
  0xe2   :  { %865 = vadd.xlane.f32.xlu1 %v864_v51  ;;  %862 = vadd.xlane.f32.xlu0 %v861_v58 }
 0x109   :  { %v1286_v49 = vpop.xlane.xlu1 %1285  ;;  %v1289_v62 = vpop.xlane.xlu0 %1288 }
 0x10a   :  { %v1332_v50 = vmul.f32 0.25, %v1286_v49  ;;  %v1333_v46 = vmul.f32 0.25, %v1289_v62 }
 0x10c   :  { %v2741_v48 = vsub.f32 %v1204_v3, %v1332_v50  ;;  %v2745_v21 = vsub.f32 %v1205_v4, %v1333_v46 }
 0x10d   :  { %v1310_v63 = vpop.xlane.xlu0 %1309 }
 0x10e   :  { %3915 = vst [vmem:[#allocation6_spill] sm:$0xff] %v2741_v48  ;;  %v1340_v57 = vmul.f32 0.25, %v1310_v63  ;;  %v1365_v47 = vmul.f32 %v2745_v21, %v2745_v21  ;;  %v1364_v51 = vmul.f32 %v2741_v48, %v2741_v48  ;;  %v1319_v58 = vpop.xlane.xlu1 %1318 }
 0x110   :  { %v2753_v62 = vsub.f32 %v1212_v6, %v1340_v57  ;;  %1398 = vrot.lane.b32.xlu1 %v1365_v47, %s2335_s17  ;;  %1396 = vrot.lane.b32.xlu0 %v1364_v51, %s2335_s17  ;;  %v1343_v57 = vmul.f32 0.25, %v1319_v58 }
 0x111   :  { %v1313_v3 = vpop.xlane.xlu0 %1312 }
 0x112   :  { %3916 = vst [vmem:[#allocation7_spill] sm:$0xff] %v2753_v62  ;;  %v1341_v4 = vmul.f32 0.25, %v1313_v3  ;;  %v1372_v50 = vmul.f32 %v2753_v62, %v2753_v62  ;;  %v1298_v63 = vpop.xlane.xlu1 %1297 }
 0x114   :  { %v2761_v46 = vsub.f32 %v1213_v8, %v1341_v4  ;;  %1412 = vrot.lane.b32.xlu1 %v1372_v50, %s2335_s17 }
 0x115   :  { %v1292_v49 = vpop.xlane.xlu0 %1291 }
 0x116   :  { %3917 = vst [vmem:[#allocation8_spill] sm:$0xff] %v2761_v46  ;;  %v1334_v27 = vmul.f32 0.25, %v1292_v49  ;;  %v1373_v6 = vmul.f32 %v2761_v46, %v2761_v46  ;;  %v1325_v4 = vpop.xlane.xlu1 %1324  ;;  %v2779_v49 = vsub.f32 %v1215_v25, %v1343_v57 }
 0x117   :  { %v1345_v25 = vmul.f32 0.25, %v1325_v4 }
 0x118   :  { %v2768_v47 = vsub.f32 %v1206_v13, %v1334_v27  ;;  %1414 = vrot.lane.b32.xlu0 %v1373_v6, %s2335_s17  ;;  %3920 = vst [vmem:[#allocation11_spill] sm:$0xff] %v2779_v49  ;;  %v1336_v13 = vmul.f32 0.25, %v1298_v63  ;;  %v1375_v57 = vmul.f32 %v2779_v49, %v2779_v49  ;;  %v3934_v49 = vunpack.c.h.bf16 %v2461_v26 }
 0x119   :  { %v1295_v51 = vpop.xlane.xlu0 %1294  ;;  %v3938_v26 = vunpack.c.h.bf16 %v2378_v1 }
 0x11a   :  { %3918 = vst [vmem:[#allocation9_spill] sm:$0xff] %v2768_v47  ;;  %v1335_v3 = vmul.f32 0.25, %v1295_v51  ;;  %v1366_v8 = vmul.f32 %v2768_v47, %v2768_v47 }
 0x11c   :  { %v2775_v50 = vsub.f32 %v1207_v14, %v1335_v3  ;;  %1400 = vrot.lane.b32.xlu1 %v1366_v8, %s2335_s17  ;;  %v2790_v14 = vsub.f32 %v1208_v17, %v1336_v13  ;;  %v1307_v3 = vpop.xlane.xlu1 %1306  ;;  %v2803_v17 = vsub.f32 %v1217_v29, %v1345_v25 }
 0x11d   :  { %v1316_v27 = vpop.xlane.xlu0 %1315 }
 0x11e   :  { %3919 = vst [vmem:[#allocation10_spill] sm:$0xff] %v2775_v50  ;;  %v1342_v6 = vmul.f32 0.25, %v1316_v27  ;;  %v1367_v58 = vmul.f32 %v2775_v50, %v2775_v50  ;;  %3922 = vst [vmem:[#allocation13_spill] sm:$0xff] %v2790_v14  ;;  %v1368_v4 = vmul.f32 %v2790_v14, %v2790_v14  ;;  %v1377_v29 = vmul.f32 %v2803_v17, %v2803_v17 }
 0x11f   :  { %3924 = vst [vmem:[#allocation15_spill] sm:$0xff] %v2803_v17  ;;  %v3951_v50 = vunpack.c.l.bf16 %v2639_v56 }
 0x120   :  { %v2786_v51 = vsub.f32 %v1214_v18, %v1342_v6  ;;  %1402 = vrot.lane.b32.xlu0 %v1367_v58, %s2335_s17  ;;  %v1331_v6 = vpop.xlane.xlu1 %1330 }
 0x121   :  { %v1301_v63 = vpop.xlane.xlu0 %1300  ;;  %v1347_v25 = vmul.f32 0.25, %v1331_v6 }
 0x122   :  { %3921 = vst [vmem:[#allocation12_spill] sm:$0xff] %v2786_v51  ;;  %v1337_v8 = vmul.f32 0.25, %v1301_v63  ;;  %v1374_v27 = vmul.f32 %v2786_v51, %v2786_v51  ;;  %v1339_v63 = vmul.f32 0.25, %v1307_v3 }
 0x124   :  { %v2799_v18 = vsub.f32 %v1209_v22, %v1337_v8  ;;  %1416 = vrot.lane.b32.xlu1 %v1374_v27, %s2335_s17  ;;  %1418 = vrot.lane.b32.xlu0 %v1375_v57, %s2335_s17  ;;  %v2821_v8 = vsub.f32 %v1211_v34, %v1339_v63  ;;  %v3861_v63 = vunpack.c.h.bf16 %v2700_v54 }
 0x125   :  { %v1322_v13 = vpop.xlane.xlu0 %1321 }
 0x126   :  { %3923 = vst [vmem:[#allocation14_spill] sm:$0xff] %v2799_v18  ;;  %v1344_v58 = vmul.f32 0.25, %v1322_v13  ;;  %v1369_v45 = vmul.f32 %v2799_v18, %v2799_v18  ;;  %3926 = vst [vmem:[#allocation17_spill] sm:$0xff] %v2821_v8  ;;  %v1371_v6 = vmul.f32 %v2821_v8, %v2821_v8 }
 0x128   :  { %v2813_v22 = vsub.f32 %v1216_v28, %v1344_v58  ;;  %1404 = vrot.lane.b32.xlu1 %v1368_v4, %s2335_s17  ;;  %1406 = vrot.lane.b32.xlu0 %v1369_v45, %s2335_s17  ;;  %v2833_v45 = vsub.f32 %v1219_v37, %v1347_v25  ;;  %v3865_v25 = vunpack.c.l.bf16 %v2592_v39 }
 0x129   :  { %v1304_v57 = vpop.xlane.xlu0 %1303 }
 0x12a   :  { %3925 = vst [vmem:[#allocation16_spill] sm:$0xff] %v2813_v22  ;;  %v1338_v3 = vmul.f32 0.25, %v1304_v57  ;;  %v1376_v27 = vmul.f32 %v2813_v22, %v2813_v22  ;;  %3928 = vst [vmem:[#allocation19_spill] sm:$0xff] %v2833_v45  ;;  %v1379_v37 = vmul.f32 %v2833_v45, %v2833_v45 }
 0x12c   :  { %v2827_v28 = vsub.f32 %v1210_v33, %v1338_v3  ;;  %1420 = vrot.lane.b32.xlu1 %v1376_v27, %s2335_s17  ;;  %1422 = vrot.lane.b32.xlu0 %v1377_v29, %s2335_s17  ;;  %v3862_v29 = vunpack.c.h.bf16 %v2627_v12  ;;  %v3859_v3 = vunpack.c.h.bf16 %v2639_v56  ;;  %v64_v27 = vsel %vm60_vm0, %v3865_v25, 0.0 }
 0x12d   :  { %v1328_v4 = vpop.xlane.xlu0 %1327 }
 0x12e   :  { %3927 = vst [vmem:[#allocation18_spill] sm:$0xff] %v2827_v28  ;;  %v1346_v13 = vmul.f32 0.25, %v1328_v4  ;;  %v1370_v34 = vmul.f32 %v2827_v28, %v2827_v28  ;;  %v88_v57 = vsel %vm60_vm0, %v3862_v29, 0.0  ;;  %v3860_v4 = vunpack.c.l.bf16 %v2615_v23  ;;  %v2889_v29 = vld [vmem:[%s3823_s0 + $0x60] sm:$0xf] }
 0x130   :  { %v2841_v33 = vsub.f32 %v1218_v36, %v1346_v13  ;;  %1408 = vrot.lane.b32.xlu1 %v1370_v34, %s2335_s17  ;;  %1410 = vrot.lane.b32.xlu0 %v1371_v6, %s2335_s17  ;;  %v85_v36 = vsel %vm60_vm0, %v3861_v63, 0.0  ;;  %v70_v13 = vsel %vm60_vm0, %v3859_v3, 0.0  ;;  %v3863_v34 = vunpack.c.h.bf16 %v2648_v60  ;;  %v448_v3 = vpop.xlane.xlu1 %447 }
 0x131   :  { %v67_v6 = vsel %vm60_vm0, %v3860_v4, 0.0 }
 0x132   :  { %3929 = vst [vmem:[#allocation20_spill] sm:$0xff] %v2841_v33  ;;  %v1378_v58 = vmul.f32 %v2841_v33, %v2841_v33  ;;  %v3884_v33 = vunpack.c.h.bf16 %v2682_v32 }
 0x134   :  { %1424 = vrot.lane.b32.xlu1 %v1378_v58, %s2335_s17  ;;  %1426 = vrot.lane.b32.xlu0 %v1379_v37, %s2335_s17  ;;  %v3864_v37 = vunpack.c.l.bf16 %v2718_v59  ;;  %v2876_v58 = vld [vmem:[%s3823_s0 + $0x20] sm:$0xf]  ;;  %v472_v44 = vpop.xlane.xlu1 %471 }
 0x135   :  { %v3869_v63 = vunpack.c.l.bf16 %v2876_v58 }
 0x136   :  { %v91_v4 = vsel %vm60_vm0, %v3864_v37, 0.0  ;;  %v3874_v37 = vunpack.c.l.bf16 %v2889_v29 }
 0x138   :  { %v454_v41 = vpop.xlane.xlu1 %453 }
 0x153   :  { %86 = vadd.xlane.f32.xlu0 %v85_v36  ;;  %v445_v36 = vpop.xlane.xlu0 %444 }
 0x154   :  { %v491_v28 = vmul.f32 0.25, %v445_v36 }
 0x157   :  { %89 = vadd.xlane.f32.xlu0 %v88_v57  ;;  %v94_v57 = vsel %vm60_vm0, %v3863_v34, 0.0  ;;  %v73_v34 = vsel %vm60_vm0, %v3869_v63, 0.0  ;;  %v469_v25 = vpop.xlane.xlu0 %468 }
 0x158   :  { %65 = vadd.xlane.f32.xlu1 %v64_v27  ;;  %v3867_v27 = vunpack.c.h.bf16 %v2673_v61  ;;  %v499_v22 = vmul.f32 0.25, %v469_v25 }
 0x15b   :  { %71 = vadd.xlane.f32.xlu0 %v70_v13  ;;  %v76_v13 = vsel %vm60_vm0, %v3867_v27, 0.0  ;;  %v97_v27 = vsel %vm60_vm0, %v3874_v37, 0.0  ;;  %v451_v63 = vpop.xlane.xlu0 %450  ;;  %v478_v37 = vpop.xlane.xlu1 %477 }
 0x15c   :  { %68 = vadd.xlane.f32.xlu1 %v67_v6  ;;  %v3871_v6 = vunpack.c.h.bf16 %v2687_v55 }
 0x15f   :  { %95 = vadd.xlane.f32.xlu0 %v94_v57  ;;  %v3873_v57 = vunpack.c.h.bf16 %v2705_v40  ;;  %v824_v8 = vpop.xlane.xlu1 %823 }
 0x160   :  { %92 = vadd.xlane.f32.xlu1 %v91_v4  ;;  %v100_v4 = vsel %vm60_vm0, %v3871_v6, 0.0  ;;  %v79_v6 = vsel %vm60_vm0, %v3878_v42, 0.0  ;;  %v492_v42 = vmul.f32 0.25, %v448_v3 }
 0x163   :  { %77 = vadd.xlane.f32.xlu0 %v76_v13  ;;  %v82_v13 = vsel %vm60_vm0, %v3873_v57, 0.0  ;;  %v475_v57 = vpop.xlane.xlu0 %474  ;;  %v848_v18 = vpop.xlane.xlu1 %847 }
 0x164   :  { %74 = vadd.xlane.f32.xlu1 %v73_v34  ;;  %v3882_v34 = vunpack.c.h.bf16 %v2723_v35 }
 0x167   :  { %101 = vadd.xlane.f32.xlu0 %v100_v4  ;;  %v106_v4 = vsel %vm60_vm0, %v3882_v34, 0.0  ;;  %v821_v45 = vpop.xlane.xlu0 %820  ;;  %v3932_v34 = vunpack.c.h.bf16 %v2373_v0  ;;  %v830_v51 = vpop.xlane.xlu1 %829  ;;  %v3936_v0 = vunpack.c.h.bf16 %v2383_v2  ;;  %v3940_v2 = vunpack.c.h.bf16 %v2407_v10 }
 0x168   :  { %98 = vadd.xlane.f32.xlu1 %v97_v27  ;;  %v103_v27 = vsel %vm60_vm0, %v3884_v33, 0.0  ;;  %v500_v33 = vmul.f32 0.25, %v472_v44  ;;  %v494_v44 = vmul.f32 0.25, %v454_v41  ;;  %v502_v41 = vmul.f32 0.25, %v478_v37 }
 0x169   :  { %v2927_v14 = vsub.f32 %v3932_v34, %v492_v42  ;;  %v3944_v10 = vunpack.c.h.bf16 %v2423_v15 }
 0x16a   :  { %v2940_v42 = vsub.f32 %v3936_v0, %v500_v33  ;;  %v2954_v33 = vsub.f32 %v3940_v2, %v494_v44  ;;  %v867_v2 = vmul.f32 0.25, %v821_v45  ;;  %v868_v45 = vmul.f32 0.25, %v824_v8 }
 0x16b   :  { %83 = vadd.xlane.f32.xlu0 %v82_v13  ;;  %v845_v17 = vpop.xlane.xlu0 %844  ;;  %v3930_v13 = vunpack.c.l.bf16 %v2497_v38  ;;  %3933 = vst [vmem:[#allocation22_spill] sm:$0xff] %v2927_v14 }
 0x16c   :  { %80 = vadd.xlane.f32.xlu1 %v79_v6  ;;  %3937 = vst [vmem:[#allocation24_spill] sm:$0xff] %v2940_v42  ;;  %v532_v25 = vmul.f32 %v2940_v42, %v2940_v42  ;;  %3941 = vst [vmem:[#allocation26_spill] sm:$0xff] %v2954_v33 }
 0x16d   :  { %v2923_v6 = vsub.f32 %v3930_v13, %v491_v28  ;;  %v524_v28 = vmul.f32 %v2927_v14, %v2927_v14 }
 0x16f   :  { %107 = vadd.xlane.f32.xlu0 %v106_v4  ;;  %3931 = vst [vmem:[#allocation21_spill] sm:$0xff] %v2923_v6  ;;  %v2931_v4 = vsub.f32 %v3934_v49, %v499_v22  ;;  %v523_v3 = vmul.f32 %v2923_v6, %v2923_v6  ;;  %v827_v36 = vpop.xlane.xlu0 %826  ;;  %v501_v22 = vmul.f32 0.25, %v475_v57  ;;  %v3942_v57 = vunpack.c.h.bf16 %v2390_v5 }
 0x170   :  { %104 = vadd.xlane.f32.xlu1 %v103_v27  ;;  %v493_v27 = vmul.f32 0.25, %v451_v63  ;;  %v869_v42 = vmul.f32 0.25, %v827_v36  ;;  %v3950_v6 = vunpack.c.l.bf16 %v2600_v52 }
 0x171   :  { %3935 = vst [vmem:[#allocation23_spill] sm:$0xff] %v2931_v4  ;;  %v531_v63 = vmul.f32 %v2931_v4, %v2931_v4  ;;  %v2960_v13 = vsub.f32 %v3942_v57, %v501_v22  ;;  %v3946_v57 = vunpack.c.h.bf16 %v2497_v38  ;;  %v3948_v38 = vunpack.c.h.bf16 %v2600_v52 }
 0x172   :  { %v2944_v49 = vsub.f32 %v3938_v26, %v493_v27  ;;  %v854_v27 = vpop.xlane.xlu1 %853  ;;  %v3952_v52 = vunpack.c.h.bf16 %v2615_v23 }
 0x173   :  { %v851_v34 = vpop.xlane.xlu0 %850  ;;  %3943 = vst [vmem:[#allocation27_spill] sm:$0xff] %v2960_v13  ;;  %v533_v0 = vmul.f32 %v2960_v13, %v2960_v13  ;;  %v3947_v13 = vunpack.c.l.bf16 %v2627_v12 }
 0x174   :  { %3939 = vst [vmem:[#allocation25_spill] sm:$0xff] %v2944_v49  ;;  %v525_v1 = vmul.f32 %v2944_v49, %v2944_v49  ;;  %v877_v36 = vmul.f32 0.25, %v851_v34 }
 0x176   :  { %v2974_v5 = vpop.xlane.xlu1 %459 }
 0x177   :  { %v2972_v37 = vpop.xlane.xlu0 %456 }
 0x17a   :  { %v2983_v15 = vpop.xlane.xlu1 %483 }
 0x17b   :  { %v2981_v26 = vpop.xlane.xlu0 %480 }
 0x17f   :  { %v2985_v22 = vpop.xlane.xlu0 %462 }
 0x181   :  { %555 = vrot.lane.b32.xlu1 %v523_v3, %s2335_s17  ;;  %v526_v3 = vmul.f32 %v2954_v33, %v2954_v33 }
 0x185   :  { %571 = vrot.lane.b32.xlu1 %v531_v63, %s2335_s17  ;;  %557 = vrot.lane.b32.xlu0 %v524_v28, %s2335_s17  ;;  %v2968_v28 = vsub.f32 %v3944_v10, %v502_v41  ;;  %v2987_v63 = vpop.xlane.xlu1 %465  ;;  %v875_v10 = vmul.f32 0.25, %v845_v17  ;;  %v870_v17 = vmul.f32 0.25, %v830_v51 }
 0x187   :  { %3945 = vst [vmem:[#allocation28_spill] sm:$0xff] %v2968_v28  ;;  %v534_v44 = vmul.f32 %v2968_v28, %v2968_v28  ;;  %v3003_v28 = vsub.f32 %v3947_v13, %v875_v10  ;;  %v3949_v13 = vunpack.c.h.bf16 %v2592_v39  ;;  %v3026_v14 = vsub.f32 %v3950_v6, %v870_v17 }
 0x189   :  { %573 = vrot.lane.b32.xlu1 %v532_v25, %s2335_s17  ;;  %559 = vrot.lane.b32.xlu0 %v525_v1, %s2335_s17  ;;  %v2989_v25 = vpop.xlane.xlu0 %486  ;;  %v2991_v1 = vpop.xlane.xlu1 %489  ;;  %v3020_v10 = vsub.f32 %v3949_v13, %v868_v45  ;;  %v3035_v45 = vsub.f32 %v3951_v50, %v869_v42  ;;  %v902_v17 = vmul.f32 %v3026_v14, %v3026_v14 }
 0x18b   :  { %v901_v34 = vmul.f32 %v3035_v45, %v3035_v45 }
 0x18d   :  { %561 = vrot.lane.b32.xlu1 %v526_v3, %s2335_s17  ;;  %575 = vrot.lane.b32.xlu0 %v533_v0, %s2335_s17  ;;  %v2993_v41 = vpop.xlane.xlu0 %832  ;;  %v2997_v3 = vsub.f32 %v3946_v57, %v867_v2  ;;  %v2999_v0 = vpop.xlane.xlu1 %835 }
 0x18f   :  { %v899_v49 = vmul.f32 %v2997_v3, %v2997_v3 }
 0x191   :  { %577 = vrot.lane.b32.xlu1 %v534_v44, %s2335_s17  ;;  %v876_v44 = vmul.f32 0.25, %v848_v18  ;;  %v3007_v33 = vpop.xlane.xlu0 %856  ;;  %v3009_v4 = vpop.xlane.xlu1 %859  ;;  %v915_v57 = vsel %vm60_vm0, %v899_v49, 0.0  ;;  %v907_v18 = vmul.f32 %v3003_v28, %v3003_v28 }
 0x193   :  { %v3013_v2 = vsub.f32 %v3948_v38, %v876_v44  ;;  %v878_v44 = vmul.f32 0.25, %v854_v27  ;;  %v939_v51 = vsel %vm60_vm0, %v907_v18, 0.0  ;;  %v3953_v18 = vunpack.c.l.bf16 %v2648_v60 }
 0x195   :  { %v3022_v8 = vpop.xlane.xlu0 %838  ;;  %v3028_v38 = vpop.xlane.xlu1 %841  ;;  %v908_v49 = vmul.f32 %v3013_v2, %v3013_v2  ;;  %v3041_v6 = vsub.f32 %v3952_v52, %v878_v44  ;;  %v3048_v13 = vsub.f32 %v3953_v18, %v877_v36  ;;  %v924_v44 = vsel %vm60_vm0, %v902_v17, 0.0 }
 0x196   :  { %v921_v36 = vsel %vm60_vm0, %v901_v34, 0.0 }
 0x197   :  { %v942_v27 = vsel %vm60_vm0, %v908_v49, 0.0  ;;  %v910_v49 = vmul.f32 %v3041_v6, %v3041_v6  ;;  %v909_v52 = vmul.f32 %v3048_v13, %v3048_v13 }
 0x199   :  { %v3050_v50 = vpop.xlane.xlu0 %862  ;;  %v948_v18 = vsel %vm60_vm0, %v910_v49, 0.0  ;;  %v945_v47 = vsel %vm60_vm0, %v909_v52, 0.0 }
 0x1ac   :  { %916 = vadd.xlane.f32.xlu0 %v915_v57  ;;  %v900_v57 = vmul.f32 %v3020_v10, %v3020_v10 }
 0x1ae   :  { %v918_v42 = vsel %vm60_vm0, %v900_v57, 0.0 }
 0x1b0   :  { %940 = vadd.xlane.f32.xlu0 %v939_v51  ;;  %v3055_v51 = vpop.xlane.xlu1 %865 }
 0x1b4   :  { %943 = vadd.xlane.f32.xlu0 %v942_v27  ;;  %v1397_v27 = vpop.permute.xlu0 %1396  ;;  %v1399_v57 = vpop.permute.xlu1 %1398 }
 0x1b5   :  { %919 = vadd.xlane.f32.xlu1 %v918_v42  ;;  %v1447_v17 = vsel %vm60_vm0, %v1399_v57, 0.0 }
 0x1b8   :  { %925 = vadd.xlane.f32.xlu0 %v924_v44  ;;  %v1415_v42 = vpop.permute.xlu0 %1414  ;;  %v1444_v44 = vsel %vm60_vm0, %v1397_v27, 0.0  ;;  %v1413_v46 = vpop.permute.xlu1 %1412 }
 0x1b9   :  { %922 = vadd.xlane.f32.xlu1 %v921_v36  ;;  %v1471_v62 = vsel %vm60_vm0, %v1415_v42, 0.0  ;;  %v1468_v36 = vsel %vm60_vm0, %v1413_v46, 0.0  ;;  %v496_v46 = vmul.f32 0.25, %v2974_v5  ;;  %v3954_v42 = vunpack.c.h.bf16 %v2412_v11 }
 0x1ba   :  { %v497_v5 = vmul.f32 0.25, %v2985_v22  ;;  %v505_v22 = vmul.f32 0.25, %v2989_v25 }
 0x1bc   :  { %949 = vadd.xlane.f32.xlu0 %v948_v18  ;;  %v1403_v34 = vpop.permute.xlu0 %1402  ;;  %v1401_v48 = vpop.permute.xlu1 %1400 }
 0x1bd   :  { %946 = vadd.xlane.f32.xlu1 %v945_v47  ;;  %v1453_v49 = vsel %vm60_vm0, %v1403_v34, 0.0  ;;  %v1450_v47 = vsel %vm60_vm0, %v1401_v48, 0.0  ;;  %v3956_v48 = vunpack.c.h.bf16 %v2396_v7  ;;  %v3960_v7 = vunpack.c.h.bf16 %v2435_v19 }
 0x1bf   :  { %v3082_v34 = vsub.f32 %v3956_v48, %v496_v46 }
 0x1c0   :  { %1448 = vadd.xlane.f32.xlu0 %v1447_v17  ;;  %v1419_v52 = vpop.permute.xlu0 %1418  ;;  %v1417_v57 = vpop.permute.xlu1 %1416 }
 0x1c1   :  { %1445 = vadd.xlane.f32.xlu1 %v1444_v44  ;;  %v1477_v27 = vsel %vm60_vm0, %v1419_v52, 0.0  ;;  %v1474_v18 = vsel %vm60_vm0, %v1417_v57, 0.0  ;;  %v503_v44 = vmul.f32 0.25, %v2981_v26  ;;  %3957 = vst [vmem:[#allocation30_spill] sm:$0xff] %v3082_v34  ;;  %v3958_v52 = vunpack.c.h.bf16 %v2428_v16 }
 0x1c2   :  { %v528_v11 = vmul.f32 %v3082_v34, %v3082_v34  ;;  %v3962_v16 = vunpack.c.h.bf16 %v2402_v9  ;;  %v506_v9 = vmul.f32 0.25, %v2991_v1 }
 0x1c4   :  { %1472 = vadd.xlane.f32.xlu0 %v1471_v62  ;;  %v495_v62 = vmul.f32 0.25, %v2972_v37  ;;  %v3089_v37 = vsub.f32 %v3958_v52, %v503_v44  ;;  %v3104_v57 = vsub.f32 %v3962_v16, %v497_v5  ;;  %v1405_v1 = vpop.permute.xlu1 %1404  ;;  %v1407_v48 = vpop.permute.xlu0 %1406  ;;  %v879_v5 = vmul.f32 0.25, %v3007_v33 }
 0x1c5   :  { %1469 = vadd.xlane.f32.xlu1 %v1468_v36  ;;  %v504_v36 = vmul.f32 0.25, %v2983_v15  ;;  %v874_v33 = vmul.f32 0.25, %v3028_v38 }
 0x1c6   :  { %v3077_v17 = vsub.f32 %v3954_v42, %v495_v62  ;;  %3959 = vst [vmem:[#allocation31_spill] sm:$0xff] %v3089_v37  ;;  %v535_v15 = vmul.f32 %v3089_v37, %v3089_v37  ;;  %3963 = vst [vmem:[#allocation33_spill] sm:$0xff] %v3104_v57  ;;  %v3966_v62 = vunpack.c.h.bf16 %v2440_v20 }
 0x1c7   :  { %v3097_v26 = vsub.f32 %v3960_v7, %v504_v36  ;;  %v871_v36 = vmul.f32 0.25, %v2993_v41  ;;  %v880_v7 = vmul.f32 0.25, %v3009_v4  ;;  %v872_v41 = vmul.f32 0.25, %v2999_v0 }
 0x1c8   :  { %1454 = vadd.xlane.f32.xlu0 %v1453_v49  ;;  %3955 = vst [vmem:[#allocation29_spill] sm:$0xff] %v3077_v17  ;;  %v527_v49 = vmul.f32 %v3077_v17, %v3077_v17  ;;  %v3120_v46 = vsub.f32 %v3966_v62, %v505_v22  ;;  %v3975_v62 = vunpack.c.l.bf16 %v2668_v53 }
 0x1c9   :  { %1451 = vadd.xlane.f32.xlu1 %v1450_v47  ;;  %3961 = vst [vmem:[#allocation32_spill] sm:$0xff] %v3097_v26  ;;  %v498_v47 = vmul.f32 0.25, %v2987_v63  ;;  %v536_v19 = vmul.f32 %v3097_v26, %v3097_v26  ;;  %v529_v63 = vmul.f32 %v3104_v57, %v3104_v57  ;;  %v110_v26 = vmul.f32 0.25, %v2657_v43 }
 0x1ca   :  { %3967 = vst [vmem:[#allocation35_spill] sm:$0xff] %v3120_v46  ;;  %v537_v44 = vmul.f32 %v3120_v46, %v3120_v46 }
 0x1cc   :  { %1478 = vadd.xlane.f32.xlu0 %v1477_v27  ;;  %v3964_v27 = vunpack.c.h.bf16 %v2455_v24  ;;  %v3968_v24 = vunpack.c.h.bf16 %v2473_v30  ;;  %v3970_v30 = vunpack.c.l.bf16 %v2673_v61 }
 0x1cd   :  { %1475 = vadd.xlane.f32.xlu1 %v1474_v18 }
 0x1ce   :  { %v3113_v18 = vsub.f32 %v3964_v27, %v498_v47  ;;  %v3128_v42 = vsub.f32 %v3968_v24, %v506_v9  ;;  %v3140_v52 = vsub.f32 %v3970_v30, %v871_v36  ;;  %v3973_v27 = vunpack.c.l.bf16 %v2682_v32 }
 0x1cf   :  { %v873_v24 = vmul.f32 0.25, %v3022_v8  ;;  %v882_v36 = vmul.f32 0.25, %v3055_v51  ;;  %v881_v8 = vmul.f32 0.25, %v3050_v50 }
 0x1d0   :  { %3965 = vst [vmem:[#allocation34_spill] sm:$0xff] %v3113_v18  ;;  %v530_v25 = vmul.f32 %v3113_v18, %v3113_v18  ;;  %3969 = vst [vmem:[#allocation36_spill] sm:$0xff] %v3128_v42  ;;  %v538_v20 = vmul.f32 %v3128_v42, %v3128_v42  ;;  %v903_v22 = vmul.f32 %v3140_v52, %v3140_v52 }
 0x1d2   :  { %v927_v9 = vsel %vm60_vm0, %v903_v22, 0.0 }
 0x1de   :  { %563 = vrot.lane.b32.xlu1 %v527_v49, %s2335_s17  ;;  %v1421_v49 = vpop.permute.xlu1 %1420 }
 0x1e2   :  { %579 = vrot.lane.b32.xlu1 %v535_v15, %s2335_s17  ;;  %565 = vrot.lane.b32.xlu0 %v528_v11, %s2335_s17  ;;  %v1423_v11 = vpop.permute.xlu0 %1422  ;;  %v3971_v15 = vunpack.c.l.bf16 %v2687_v55  ;;  %v1409_v16 = vpop.permute.xlu1 %1408 }
 0x1e3   :  { %v1483_v46 = vsel %vm60_vm0, %v1423_v11, 0.0 }
 0x1e4   :  { %v3146_v47 = vsub.f32 %v3971_v15, %v879_v5 }
 0x1e6   :  { %581 = vrot.lane.b32.xlu1 %v536_v19, %s2335_s17  ;;  %567 = vrot.lane.b32.xlu0 %v529_v63, %s2335_s17  ;;  %3972 = vst [vmem:[#allocation37_spill] sm:$0xff] %v3146_v47  ;;  %v1411_v19 = vpop.permute.xlu0 %1410  ;;  %v3153_v63 = vsub.f32 %v3973_v27, %v880_v7  ;;  %v911_v4 = vmul.f32 %v3146_v47, %v3146_v47  ;;  %v1425_v0 = vpop.permute.xlu1 %1424  ;;  %v3979_v7 = vunpack.c.l.bf16 %v2705_v40  ;;  %v3981_v27 = vunpack.c.h.bf16 %v2718_v59 }
 0x1e7   :  { %v1486_v11 = vsel %vm60_vm0, %v1425_v0, 0.0  ;;  %v3242_v0 = vld [vmem:[%s3825_s2] ss:$0 sm:$0xff] }
 0x1e8   :  { %3974 = vst [vmem:[#allocation38_spill] sm:$0xff] %v3153_v63  ;;  %v951_v30 = vsel %vm60_vm0, %v911_v4, 0.0  ;;  %v912_v5 = vmul.f32 %v3153_v63, %v3153_v63  ;;  %v3174_v15 = vsub.f32 %v3979_v7, %v873_v24  ;;  %v3181_v51 = vsub.f32 %v3981_v27, %v882_v36 }
 0x1ea   :  { %569 = vrot.lane.b32.xlu1 %v530_v25, %s2335_s17  ;;  %583 = vrot.lane.b32.xlu0 %v537_v44, %s2335_s17  ;;  %v3161_v25 = vsub.f32 %v3975_v62, %v872_v41  ;;  %v3977_v44 = vunpack.c.l.bf16 %v2700_v54  ;;  %v1427_v38 = vpop.permute.xlu0 %1426  ;;  %3980 = vst [vmem:[#allocation41_spill] sm:$0xff] %v3174_v15  ;;  %v66_v41 = vpop.xlane.xlu1 %65  ;;  %3982 = vst [vmem:[#allocation42_spill] sm:$0xff] %v3181_v51  ;;  %v3983_v62 = vunpack.c.l.bf16 %v2723_v35 }
 0x1eb   :  { %v111_v37 = vmul.f32 0.25, %v66_v41 }
 0x1ec   :  { %3976 = vst [vmem:[#allocation39_spill] sm:$0xff] %v3161_v25  ;;  %v904_v22 = vmul.f32 %v3161_v25, %v3161_v25  ;;  %v3190_v24 = vsub.f32 %v3983_v62, %v881_v8  ;;  %v3987_v25 = vunpack.c.h.bf16 %v2627_v12  ;;  %v3989_v12 = vunpack.c.h.bf16 %v2639_v56 }
 0x1ee   :  { %585 = vrot.lane.b32.xlu1 %v538_v20, %s2335_s17  ;;  %v3166_v20 = vsub.f32 %v3977_v44, %v874_v33  ;;  %v3183_v33 = vpop.xlane.xlu0 %86  ;;  %3984 = vst [vmem:[#allocation43_spill] sm:$0xff] %v3190_v24  ;;  %v930_v50 = vsel %vm60_vm0, %v904_v22, 0.0  ;;  %v905_v44 = vmul.f32 %v3174_v15, %v3174_v15  ;;  %v3195_v36 = vpop.xlane.xlu1 %68  ;;  %v913_v8 = vmul.f32 %v3190_v24, %v3190_v24 }
 0x1ef   :  { %v3986_v15 = vunpack.c.l.bf16 %v2478_v31  ;;  %v118_v63 = vmul.f32 0.25, %v3183_v33  ;;  %v112_v31 = vmul.f32 0.25, %v3195_v36 }
 0x1f0   :  { %3978 = vst [vmem:[#allocation40_spill] sm:$0xff] %v3166_v20  ;;  %v906_v4 = vmul.f32 %v3166_v20, %v3166_v20  ;;  %v933_v7 = vsel %vm60_vm0, %v905_v44, 0.0 }
 0x1f1   :  { %v3266_v20 = vsub.f32 %v3986_v15, %v110_v26 }
 0x1f2   :  { %v90_v27 = vpop.xlane.xlu0 %89  ;;  %v3205_v62 = vpop.xlane.xlu1 %92 }
 0x1f3   :  { %v119_v34 = vmul.f32 0.25, %v90_v27  ;;  %v142_v15 = vmul.f32 %v3266_v20, %v3266_v20 }
 0x1f5   :  { %v3273_v41 = vsub.f32 %v3987_v25, %v119_v34 }
 0x1f6   :  { %v3209_v44 = vpop.xlane.xlu1 %74 }
 0x209   :  { %928 = vadd.xlane.f32.xlu0 %v927_v9  ;;  %v954_v9 = vsel %vm60_vm0, %v912_v5, 0.0  ;;  %v914_v5 = vmul.f32 %v3181_v51, %v3181_v51  ;;  %v3985_v51 = vunpack.c.l.bf16 %v2592_v39  ;;  %v3988_v39 = vunpack.c.h.bf16 %v2700_v54 }
 0x20a   :  { %v151_v54 = vmul.f32 %v3273_v41, %v3273_v41 }
 0x20b   :  { %v960_v22 = vsel %vm60_vm0, %v914_v5, 0.0  ;;  %v1480_v5 = vsel %vm60_vm0, %v1421_v49, 0.0  ;;  %v3262_v24 = vsub.f32 %v3985_v51, %v111_v37  ;;  %v3279_v37 = vsub.f32 %v3988_v39, %v118_v63 }
 0x20c   :  { %v3990_v63 = vunpack.c.l.bf16 %v2615_v23  ;;  %v158_v39 = vsel %vm60_vm0, %v142_v15, 0.0 }
 0x20d   :  { %952 = vadd.xlane.f32.xlu0 %v951_v30  ;;  %v936_v30 = vsel %vm60_vm0, %v906_v4, 0.0  ;;  %v72_v4 = vpop.xlane.xlu0 %71  ;;  %v143_v27 = vmul.f32 %v3262_v24, %v3262_v24  ;;  %v150_v56 = vmul.f32 %v3279_v37, %v3279_v37 }
 0x20e   :  { %v113_v43 = vmul.f32 0.25, %v72_v4  ;;  %v3297_v36 = vsub.f32 %v3990_v63, %v112_v31  ;;  %v120_v4 = vmul.f32 0.25, %v3205_v62  ;;  %v3992_v62 = vunpack.c.l.bf16 %v2718_v59 }
 0x20f   :  { %v161_v33 = vsel %vm60_vm0, %v143_v27, 0.0 }
 0x210   :  { %v3290_v34 = vsub.f32 %v3989_v12, %v113_v43  ;;  %v185_v12 = vsel %vm60_vm0, %v151_v54, 0.0  ;;  %v3314_v31 = vsub.f32 %v3992_v62, %v120_v4  ;;  %v144_v63 = vmul.f32 %v3297_v36, %v3297_v36 }
 0x211   :  { %955 = vadd.xlane.f32.xlu0 %v954_v9  ;;  %v957_v9 = vsel %vm60_vm0, %v913_v8, 0.0  ;;  %v1465_v8 = vsel %vm60_vm0, %v1411_v19, 0.0 }
 0x212   :  { %931 = vadd.xlane.f32.xlu1 %v930_v50  ;;  %v1459_v50 = vsel %vm60_vm0, %v1407_v48, 0.0  ;;  %v145_v23 = vmul.f32 %v3290_v34, %v3290_v34  ;;  %v164_v59 = vsel %vm60_vm0, %v144_v63, 0.0  ;;  %v152_v4 = vmul.f32 %v3314_v31, %v3314_v31 }
 0x215   :  { %937 = vadd.xlane.f32.xlu0 %v936_v30  ;;  %v1456_v30 = vsel %vm60_vm0, %v1405_v1, 0.0  ;;  %v1489_v1 = vsel %vm60_vm0, %v1427_v38, 0.0 }
 0x216   :  { %934 = vadd.xlane.f32.xlu1 %v933_v7  ;;  %v96_v7 = vpop.xlane.xlu0 %95 }
 0x217   :  { %v121_v25 = vmul.f32 0.25, %v96_v7  ;;  %v3991_v7 = vunpack.c.h.bf16 %v2648_v60  ;;  %v167_v60 = vsel %vm60_vm0, %v145_v23, 0.0 }
 0x219   :  { %961 = vadd.xlane.f32.xlu0 %v960_v22  ;;  %v1462_v22 = vsel %vm60_vm0, %v1409_v16, 0.0  ;;  %v3307_v27 = vsub.f32 %v3991_v7, %v121_v25  ;;  %v188_v7 = vsel %vm60_vm0, %v152_v4, 0.0 }
 0x21a   :  { %958 = vadd.xlane.f32.xlu1 %v957_v9  ;;  %v3215_v9 = vpop.xlane.xlu1 %98  ;;  %v3217_v48 = vpop.xlane.xlu0 %77 }
 0x21b   :  { %v153_v25 = vmul.f32 %v3307_v27, %v3307_v27  ;;  %v115_v63 = vmul.f32 0.25, %v3217_v48 }
 0x21d   :  { %1460 = vadd.xlane.f32.xlu0 %v1459_v50 }
 0x21e   :  { %1457 = vadd.xlane.f32.xlu1 %v1456_v30  ;;  %v3223_v49 = vpop.xlane.xlu0 %101  ;;  %v3234_v30 = vld [vmem:[%s3824_s1] ss:$0 sm:$0xff] }
 0x221   :  { %1484 = vadd.xlane.f32.xlu0 %v1483_v46  ;;  %v3221_v46 = vpop.xlane.xlu1 %80 }
 0x222   :  { %1481 = vadd.xlane.f32.xlu1 %v1480_v5  ;;  %v3227_v19 = vpop.xlane.xlu0 %83 }
 0x225   :  { %1466 = vadd.xlane.f32.xlu0 %v1465_v8  ;;  %v3225_v50 = vpop.xlane.xlu1 %104 }
 0x226   :  { %1463 = vadd.xlane.f32.xlu1 %v1462_v22  ;;  %v3236_v38 = vpop.xlane.xlu0 %107 }
 0x229   :  { %1490 = vadd.xlane.f32.xlu0 %v1489_v1  ;;  %v3229_v16 = vpop.permute.xlu1 %555 }
 0x22a   :  { %1487 = vadd.xlane.f32.xlu1 %v1486_v11  ;;  %v558_v8 = vpop.permute.xlu0 %557 }
 0x22b   :  { %v606_v23 = vsel %vm60_vm0, %v558_v8, 0.0 }
 0x22d   :  { %v3244_v5 = vpop.permute.xlu1 %571 }
 0x22e   :  { %v3247_v1 = vpop.permute.xlu0 %559  ;;  %v627_v4 = vsel %vm60_vm0, %v3244_v5, 0.0 }
 0x22f   :  { %v609_v5 = vsel %vm60_vm0, %v3247_v1, 0.0  ;;  %v116_v1 = vmul.f32 0.25, %v3221_v46 }
 0x231   :  { %v574_v22 = vpop.permute.xlu1 %573 }
 0x232   :  { %v3251_v42 = vpop.permute.xlu0 %575 }
 0x235   :  { %v3249_v11 = vpop.permute.xlu1 %561 }
 0x236   :  { %v612_v48 = vsel %vm60_vm0, %v3249_v11, 0.0 }
 0x239   :  { %v3253_v57 = vpop.permute.xlu1 %577  ;;  %v3255_v18 = vpop.xlane.xlu0 %916 }
 0x23b   :  { %715 = vrot.lane.b32.xlu1 %v3234_v30, %s2336_s11 }
 0x23d   :  { %v3269_v47 = vpop.xlane.xlu0 %940 }
 0x23f   :  { %734 = vrot.lane.b32.xlu0 %v3242_v0, %s2336_s11 }
 0x241   :  { %v3286_v51 = vpop.xlane.xlu0 %943 }
 0x242   :  { %v3258_v17 = vpop.xlane.xlu1 %919 }
 0x245   :  { %v3316_v15 = vpop.xlane.xlu0 %925 }
 0x246   :  { %v3282_v26 = vpop.xlane.xlu1 %922 }
 0x24a   :  { %v3303_v43 = vpop.xlane.xlu1 %946 }
 0x24e   :  { %v3324_v54 = vpop.xlane.xlu1 %1445 }
 0x25e   :  { %162 = vadd.xlane.f32.xlu0 %v161_v33  ;;  %v182_v33 = vsel %vm60_vm0, %v150_v56, 0.0  ;;  %v191_v56 = vsel %vm60_vm0, %v153_v25, 0.0  ;;  %v114_v25 = vmul.f32 0.25, %v3209_v44  ;;  %v3994_v44 = vunpack.c.l.bf16 %v2876_v58 }
 0x25f   :  { %159 = vadd.xlane.f32.xlu1 %v158_v39  ;;  %v3329_v39 = vpop.xlane.xlu0 %949  ;;  %v636_v58 = vsel %vm60_vm0, %v3253_v57, 0.0  ;;  %v3997_v57 = vunpack.c.h.bf16 %v2705_v40 }
 0x262   :  { %186 = vadd.xlane.f32.xlu0 %v185_v12  ;;  %v3333_v12 = vpop.xlane.xlu1 %1469 }
 0x263   :  { %183 = vadd.xlane.f32.xlu1 %v182_v33  ;;  %v3336_v62 = vpop.xlane.xlu0 %1448  ;;  %v603_v33 = vsel %vm60_vm0, %v3229_v16, 0.0  ;;  %v123_v16 = vmul.f32 0.25, %v3223_v49  ;;  %v117_v49 = vmul.f32 0.25, %v3227_v19 }
 0x266   :  { %168 = vadd.xlane.f32.xlu0 %v167_v60  ;;  %v630_v60 = vsel %vm60_vm0, %v574_v22, 0.0  ;;  %v3358_v22 = vsub.f32 %v3994_v44, %v114_v25 }
 0x267   :  { %165 = vadd.xlane.f32.xlu1 %v164_v59  ;;  %v3343_v59 = vpop.xlane.xlu1 %1451  ;;  %v3347_v8 = vpop.xlane.xlu0 %1472 }
 0x268   :  { %v146_v19 = vmul.f32 %v3358_v22, %v3358_v22 }
 0x26a   :  { %192 = vadd.xlane.f32.xlu0 %v191_v56  ;;  %v3993_v56 = vunpack.c.h.bf16 %v2673_v61  ;;  %v3995_v61 = vunpack.c.h.bf16 %v2687_v55  ;;  %v633_v55 = vsel %vm60_vm0, %v3251_v42, 0.0  ;;  %v124_v42 = vmul.f32 0.25, %v3225_v50 }
 0x26b   :  { %189 = vadd.xlane.f32.xlu1 %v188_v7  ;;  %v3379_v25 = vpop.xlane.xlu0 %1454  ;;  %v4000_v50 = vunpack.c.h.bf16 %v2682_v32 }
 0x26c   :  { %v3351_v7 = vsub.f32 %v3993_v56, %v115_v63  ;;  %v3367_v63 = vsub.f32 %v3995_v61, %v123_v16  ;;  %v3998_v16 = vunpack.c.h.bf16 %v2668_v53 }
 0x26e   :  { %607 = vadd.xlane.f32.xlu0 %v606_v23  ;;  %v122_v23 = vmul.f32 0.25, %v3215_v9  ;;  %v147_v11 = vmul.f32 %v3351_v7, %v3351_v7  ;;  %v3996_v9 = vunpack.c.l.bf16 %v2889_v29  ;;  %v125_v29 = vmul.f32 0.25, %v3236_v38 }
 0x26f   :  { %604 = vadd.xlane.f32.xlu1 %v603_v33  ;;  %v3363_v33 = vpop.xlane.xlu1 %1475  ;;  %v155_v46 = vmul.f32 %v3367_v63, %v3367_v63  ;;  %v3401_v38 = vpop.xlane.xlu0 %1478 }
 0x270   :  { %v173_v56 = vsel %vm60_vm0, %v147_v11, 0.0 }
 0x271   :  { %v197_v53 = vsel %vm60_vm0, %v155_v46, 0.0  ;;  %v971_v46 = vmul.f32 0.25, %v3269_v47 }
 0x272   :  { %631 = vadd.xlane.f32.xlu0 %v630_v60  ;;  %v3376_v60 = vsub.f32 %v3996_v9, %v122_v23  ;;  %v170_v23 = vsel %vm60_vm0, %v146_v19, 0.0 }
 0x273   :  { %628 = vadd.xlane.f32.xlu1 %v627_v4  ;;  %v3387_v4 = vsub.f32 %v3997_v57, %v117_v49  ;;  %v564_v44 = vpop.permute.xlu1 %563  ;;  %v566_v19 = vpop.permute.xlu0 %565 }
 0x274   :  { %v154_v40 = vmul.f32 %v3376_v60, %v3376_v60 }
 0x275   :  { %v149_v49 = vmul.f32 %v3387_v4, %v3387_v4 }
 0x276   :  { %613 = vadd.xlane.f32.xlu0 %v612_v48  ;;  %v3395_v48 = vsub.f32 %v3998_v16, %v116_v1  ;;  %v194_v11 = vsel %vm60_vm0, %v154_v40, 0.0  ;;  %v964_v40 = vmul.f32 0.25, %v3258_v17 }
 0x277   :  { %610 = vadd.xlane.f32.xlu1 %v609_v5  ;;  %v3999_v5 = vunpack.c.h.bf16 %v2723_v35  ;;  %v580_v1 = vpop.permute.xlu1 %579  ;;  %v179_v35 = vsel %vm60_vm0, %v149_v49, 0.0  ;;  %v987_v49 = vadd.f32 1e-06, %v971_v46  ;;  %v974_v46 = vmul.f32 0.25, %v3329_v39 }
 0x278   :  { %v148_v9 = vmul.f32 %v3395_v48, %v3395_v48  ;;  %v980_v47 = vadd.f32 1e-06, %v964_v40  ;;  %v639_v17 = vsel %vm60_vm0, %v580_v1, 0.0 }
 0x279   :  { %v3405_v61 = vsub.f32 %v3999_v5, %v125_v29  ;;  %v963_v29 = vmul.f32 0.25, %v3255_v18  ;;  %v568_v5 = vpop.permute.xlu0 %567  ;;  %v972_v18 = vmul.f32 0.25, %v3286_v51  ;;  %v973_v51 = vmul.f32 0.25, %v3303_v43 }
 0x27a   :  { %637 = vadd.xlane.f32.xlu0 %v636_v58  ;;  %v3412_v58 = vsub.f32 %v4000_v50, %v124_v42  ;;  %v176_v57 = vsel %vm60_vm0, %v148_v9, 0.0  ;;  %v615_v50 = vsel %vm60_vm0, %v564_v44, 0.0 }
 0x27b   :  { %634 = vadd.xlane.f32.xlu1 %v633_v55  ;;  %v157_v55 = vmul.f32 %v3405_v61, %v3405_v61  ;;  %v582_v16 = vpop.permute.xlu1 %581 }
 0x27c   :  { %v156_v32 = vmul.f32 %v3412_v58, %v3412_v58 }
 0x27e   :  { %174 = vadd.xlane.f32.xlu0 %v173_v56  ;;  %v203_v56 = vsel %vm60_vm0, %v157_v55, 0.0  ;;  %v200_v42 = vsel %vm60_vm0, %v156_v32, 0.0  ;;  %v584_v55 = vpop.permute.xlu0 %583 }
 0x27f   :  { %171 = vadd.xlane.f32.xlu1 %v170_v23  ;;  %v979_v23 = vadd.f32 1e-06, %v963_v29  ;;  %v570_v9 = vpop.permute.xlu1 %569  ;;  %v645_v43 = vsel %vm60_vm0, %v584_v55, 0.0  ;;  %v1492_v55 = vmul.f32 0.25, %v3324_v54 }
 0x280   :  { %v624_v32 = vsel %vm60_vm0, %v570_v9, 0.0  ;;  %v1493_v9 = vmul.f32 0.25, %v3336_v62 }
 0x281   :  { %2181 = vrsqrt.f32 %v979_v23 }
 0x282   :  { %198 = vadd.xlane.f32.xlu0 %v197_v53  ;;  %v618_v53 = vsel %vm60_vm0, %v566_v19, 0.0  ;;  %2183 = vrsqrt.f32 %v987_v49  ;;  %v988_v19 = vadd.f32 1e-06, %v972_v18 }
 0x283   :  { %195 = vadd.xlane.f32.xlu1 %v194_v11  ;;  %v965_v11 = vmul.f32 0.25, %v3282_v26  ;;  %2185 = vrsqrt.f32 %v980_v47  ;;  %v621_v26 = vsel %vm60_vm0, %v568_v5, 0.0  ;;  %v586_v29 = vpop.permute.xlu1 %585  ;;  %v990_v5 = vadd.f32 1e-06, %v974_v46 }
 0x284   :  { %2187 = vrsqrt.f32 %v988_v19 }
 0x285   :  { %v981_v44 = vadd.f32 1e-06, %v965_v11 }
 0x286   :  { %180 = vadd.xlane.f32.xlu0 %v179_v35  ;;  %v642_v35 = vsel %vm60_vm0, %v582_v16, 0.0  ;;  %v989_v16 = vadd.f32 1e-06, %v973_v51 }
 0x287   :  { %177 = vadd.xlane.f32.xlu1 %v176_v57  ;;  %v966_v57 = vmul.f32 0.25, %v3316_v15  ;;  %2189 = vrsqrt.f32 %v981_v44 }
 0x289   :  { %v982_v1 = vadd.f32 1e-06, %v966_v57 }
 0x28a   :  { %204 = vadd.xlane.f32.xlu0 %v203_v56 }
 0x28b   :  { %201 = vadd.xlane.f32.xlu1 %v200_v42  ;;  %v2182_v15 = vpop.eup %2181  ;;  %v648_v42 = vsel %vm60_vm0, %v586_v29, 0.0  ;;  %2191 = vrsqrt.f32 %v982_v1  ;;  %v1508_v1 = vadd.f32 1e-06, %v1492_v55 }
 0x28c   :  { %v2184_v40 = vpop.eup %2183  ;;  %2193 = vrsqrt.f32 %v989_v16 }
 0x28d   :  { %v2186_v49 = vpop.eup %2185  ;;  %v1019_v18 = vmul.f32 %v2184_v40, %v3003_v28  ;;  %2195 = vrsqrt.f32 %v990_v5  ;;  %v1500_v28 = vmul.f32 0.25, %v3333_v12 }
 0x28e   :  { %619 = vadd.xlane.f32.xlu0 %v618_v53  ;;  %v1011_v53 = vmul.f32 %v2182_v15, %v2997_v3  ;;  %v2188_v11 = vpop.eup %2187  ;;  %v1501_v3 = vmul.f32 0.25, %v3347_v8  ;;  %v1494_v8 = vmul.f32 0.25, %v3343_v59 }
 0x28f   :  { %616 = vadd.xlane.f32.xlu1 %v615_v50  ;;  %v1035_v44 = vmul.f32 %v3234_v30, %v1019_v18  ;;  %v1503_v18 = vmul.f32 0.25, %v3401_v38 }
 0x290   :  { %v1027_v47 = vmul.f32 %v3234_v30, %v1011_v53  ;;  %v1517_v16 = vadd.f32 1e-06, %v1501_v3 }
 0x292   :  { %643 = vadd.xlane.f32.xlu0 %v642_v35  ;;  %v1012_v35 = vmul.f32 %v2186_v49, %v3020_v10  ;;  %v1043_v51 = vadd.f32 %v3242_v0, %v1027_v47  ;;  %v1495_v10 = vmul.f32 0.25, %v3379_v25  ;;  %v1510_v49 = vadd.f32 1e-06, %v1494_v8 }
 0x293   :  { %640 = vadd.xlane.f32.xlu1 %v639_v17  ;;  %v2190_v17 = vpop.eup %2189 }
 0x294   :  { %v1028_v54 = vmul.f32 %v3234_v30, %v1012_v35  ;;  %v1013_v29 = vmul.f32 %v2190_v17, %v3035_v45  ;;  %v1511_v5 = vadd.f32 1e-06, %v1495_v10 }
 0x295   :  { %v2192_v62 = vpop.eup %2191 }
 0x296   :  { %v3438_v56 = vpop.xlane.xlu0 %928  ;;  %625 = vadd.xlane.f32.xlu0 %v624_v32  ;;  %v1020_v32 = vmul.f32 %v2188_v11, %v3013_v2  ;;  %v2194_v15 = vpop.eup %2193  ;;  %v1516_v2 = vadd.f32 1e-06, %v1500_v28  ;;  %v1014_v25 = vmul.f32 %v2192_v62, %v3026_v14  ;;  %v1044_v45 = vadd.f32 %v3242_v0, %v1028_v54 }
 0x297   :  { %622 = vadd.xlane.f32.xlu1 %v621_v26  ;;  %v1509_v26 = vadd.f32 1e-06, %v1493_v9  ;;  %v1029_v59 = vmul.f32 %v3234_v30, %v1013_v29  ;;  %v2196_v53 = vpop.eup %2195  ;;  %v1021_v11 = vmul.f32 %v2194_v15, %v3048_v13  ;;  %v1502_v9 = vmul.f32 0.25, %v3363_v33 }
 0x298   :  { %v1036_v40 = vmul.f32 %v3234_v30, %v1020_v32  ;;  %v967_v17 = vmul.f32 0.25, %v3438_v56  ;;  %v1030_v38 = vmul.f32 %v3234_v30, %v1014_v25  ;;  %v2027_v3 = vpack.c.bf16 %v1044_v45, %v1044_v45 }
 0x299   :  { %2197 = vrsqrt.f32 %v1509_v26  ;;  %v1045_v13 = vadd.f32 %v3242_v0, %v1029_v59  ;;  %v1519_v33 = vadd.f32 1e-06, %v1503_v18  ;;  %v1037_v56 = vmul.f32 %v3234_v30, %v1021_v11 }
 0x29a   :  { %v3443_v23 = vpop.xlane.xlu0 %952  ;;  %649 = vadd.xlane.f32.xlu0 %v648_v42  ;;  %v1051_v42 = vadd.f32 %v3242_v0, %v1035_v44  ;;  %2199 = vrsqrt.f32 %v1508_v1  ;;  %v1052_v55 = vadd.f32 %v3242_v0, %v1036_v40  ;;  %v1022_v44 = vmul.f32 %v2196_v53, %v3041_v6 }
 0x29b   :  { %646 = vadd.xlane.f32.xlu1 %v645_v43  ;;  %v2026_v43 = vpack.c.bf16 %v1043_v51, %v1043_v51  ;;  %2201 = vrsqrt.f32 %v1517_v16  ;;  %v1518_v32 = vadd.f32 1e-06, %v1502_v9  ;;  %v983_v26 = vadd.f32 1e-06, %v967_v17 }
 0x29c   :  { %v2034_v14 = vpack.c.bf16 %v1051_v42, %v1051_v42  ;;  %2203 = vrsqrt.f32 %v1516_v2  ;;  %v2035_v10 = vpack.c.bf16 %v1052_v55, %v1052_v55  ;;  %v975_v54 = vmul.f32 0.25, %v3443_v23 }
 0x29d   :  { %2205 = vrsqrt.f32 %v1511_v5  ;;  %v2028_v29 = vpack.c.bf16 %v1045_v13, %v1045_v13  ;;  %v1046_v6 = vadd.f32 %v3242_v0, %v1030_v38  ;;  %v1053_v16 = vadd.f32 %v3242_v0, %v1037_v56  ;;  %v4001_v13 = vld [vmem:[#allocation6_spill] sm:$0xff] }
 0x29e   :  { %v3446_v50 = vpop.xlane.xlu0 %955  ;;  %2207 = vrsqrt.f32 %v1510_v49  ;;  %v991_v25 = vadd.f32 1e-06, %v975_v54 }
 0x29f   :  { %v932_v39 = vpop.xlane.xlu1 %931  ;;  %2209 = vrsqrt.f32 %v1519_v33  ;;  %v976_v1 = vmul.f32 0.25, %v3446_v50  ;;  %v2029_v5 = vpack.c.bf16 %v1046_v6, %v1046_v6  ;;  %v2036_v53 = vpack.c.bf16 %v1053_v16, %v1053_v16  ;;  %v4002_v33 = vld [vmem:[#allocation7_spill] sm:$0xff] }
 0x2a0   :  { %v968_v28 = vmul.f32 0.25, %v932_v39  ;;  %v1038_v39 = vmul.f32 %v3234_v30, %v1022_v44  ;;  %2211 = vrsqrt.f32 %v1518_v32  ;;  %v4003_v32 = vld [vmem:[#allocation8_spill] sm:$0xff] }
 0x2a1   :  { %2213 = vrsqrt.f32 %v983_v26  ;;  %v992_v59 = vadd.f32 1e-06, %v976_v1 }
 0x2a2   :  { %v3453_v19 = vpop.xlane.xlu0 %937  ;;  %v984_v8 = vadd.f32 1e-06, %v968_v28  ;;  %v1054_v49 = vadd.f32 %v3242_v0, %v1038_v39 }
 0x2a3   :  { %v3456_v57 = vpop.xlane.xlu1 %934  ;;  %v2198_v42 = vpop.eup %2197  ;;  %v970_v23 = vmul.f32 0.25, %v3453_v19 }
 0x2a4   :  { %v969_v50 = vmul.f32 0.25, %v3456_v57  ;;  %2215 = vrsqrt.f32 %v984_v8  ;;  %v1541_v57 = vmul.f32 %v2198_v42, %v2745_v21 }
 0x2a5   :  { %2217 = vrsqrt.f32 %v991_v25 }
 0x2a6   :  { %v3466_v46 = vpop.xlane.xlu0 %961  ;;  %v985_v17 = vadd.f32 1e-06, %v969_v50  ;;  %2219 = vrsqrt.f32 %v992_v59 }
 0x2a7   :  { %v3468_v12 = vpop.xlane.xlu1 %958  ;;  %v978_v55 = vmul.f32 0.25, %v3466_v46 }
 0x2a8   :  { %v977_v38 = vmul.f32 0.25, %v3468_v12 }
 0x2a9   :  { %v994_v8 = vadd.f32 1e-06, %v978_v55 }
 0x2aa   :  { %v3476_v47 = vpop.xlane.xlu0 %1460  ;;  %v993_v16 = vadd.f32 1e-06, %v977_v38 }
 0x2ab   :  { %v3480_v35 = vpop.xlane.xlu1 %1457 }
 0x2ac   :  { %1123 = vrot.lane.b32.xlu1 %v2026_v43, %s2337_s14  ;;  %v2200_v43 = vpop.eup %2199  ;;  %v1496_v25 = vmul.f32 0.25, %v3480_v35 }
 0x2ad   :  { %v2202_v40 = vpop.eup %2201  ;;  %v1540_v44 = vmul.f32 %v2200_v43, %v4001_v13 }
 0x2ae   :  { %v3488_v51 = vpop.xlane.xlu0 %1484  ;;  %v2204_v45 = vpop.eup %2203  ;;  %v1549_v26 = vmul.f32 %v2202_v40, %v4003_v32  ;;  %v1497_v40 = vmul.f32 0.25, %v3476_v47 }
 0x2af   :  { %v3491_v62 = vpop.xlane.xlu1 %1481  ;;  %v2206_v18 = vpop.eup %2205  ;;  %v1548_v28 = vmul.f32 %v2204_v45, %v4002_v33  ;;  %v1505_v13 = vmul.f32 0.25, %v3488_v51 }
 0x2b0   :  { %1125 = vrot.lane.b32.xlu0 %v2027_v3, %s2337_s14  ;;  %1139 = vrot.lane.b32.xlu1 %v2034_v14, %s2337_s14  ;;  %v2208_v19 = vpop.eup %2207  ;;  %v986_v14 = vadd.f32 1e-06, %v970_v23  ;;  %v2037_v3 = vpack.c.bf16 %v1054_v49, %v1054_v49  ;;  %v1513_v38 = vadd.f32 1e-06, %v1497_v40  ;;  %v1504_v33 = vmul.f32 0.25, %v3491_v62  ;;  %v4010_v40 = vld [vmem:[#allocation38_spill] sm:$0xff] }
 0x2b1   :  { %v2210_v6 = vpop.eup %2209  ;;  %v1521_v62 = vadd.f32 1e-06, %v1505_v13 }
 0x2b2   :  { %v3499_v15 = vpop.xlane.xlu0 %1466  ;;  %2221 = vrsqrt.f32 %v986_v14  ;;  %v2212_v1 = vpop.eup %2211 }
 0x2b3   :  { %v3502_v2 = vpop.xlane.xlu1 %1463  ;;  %2223 = vrsqrt.f32 %v985_v17  ;;  %v2214_v23 = vpop.eup %2213  ;;  %v4007_v17 = vld [vmem:[#allocation11_spill] sm:$0xff] }
 0x2b4   :  { %1127 = vrot.lane.b32.xlu0 %v2028_v29, %s2337_s14  ;;  %1141 = vrot.lane.b32.xlu1 %v2035_v10, %s2337_s14  ;;  %v4004_v10 = vld [vmem:[#allocation9_spill] sm:$0xff]  ;;  %v4005_v29 = vld [vmem:[#allocation10_spill] sm:$0xff]  ;;  %2225 = vrsqrt.f32 %v994_v8  ;;  %v1551_v35 = vmul.f32 %v2210_v6, %v4007_v17  ;;  %v1015_v55 = vmul.f32 %v2214_v23, %v3140_v52  ;;  %v1499_v6 = vmul.f32 0.25, %v3499_v15 }
 0x2b5   :  { %v1542_v54 = vmul.f32 %v2208_v19, %v4004_v10  ;;  %v1543_v21 = vmul.f32 %v2206_v18, %v4005_v29  ;;  %2227 = vrsqrt.f32 %v993_v16  ;;  %v4012_v17 = vld [vmem:[#allocation41_spill] sm:$0xff] }
 0x2b6   :  { %v3509_v11 = vpop.xlane.xlu0 %1490 }
 0x2b7   :  { %v3511_v9 = vpop.xlane.xlu1 %1487 }
 0x2b8   :  { %1143 = vrot.lane.b32.xlu0 %v2036_v53, %s2337_s14  ;;  %1129 = vrot.lane.b32.xlu1 %v2029_v5, %s2337_s14  ;;  %v2216_v53 = vpop.eup %2215 }
 0x2ba   :  { %v3529_v42 = vpop.permute.xlu0 %734 }
 0x2bb   :  { %v3520_v56 = vpop.permute.xlu1 %715 }
 0x2bc   :  { %1145 = vrot.lane.b32.xlu1 %v2037_v3, %s2337_s14  ;;  %v1556_v46 = vmul.f32 %v1540_v44, %v3520_v56  ;;  %v1557_v12 = vmul.f32 %v1541_v57, %v3520_v56  ;;  %v1564_v39 = vmul.f32 %v1548_v28, %v3520_v56  ;;  %v1565_v43 = vmul.f32 %v1549_v26, %v3520_v56  ;;  %v4006_v57 = vld [vmem:[#allocation12_spill] sm:$0xff]  ;;  %v2218_v44 = vpop.eup %2217  ;;  %v4008_v26 = vld [vmem:[#allocation39_spill] sm:$0xff] }
 0x2bd   :  { %v1558_v45 = vmul.f32 %v1542_v54, %v3520_v56  ;;  %v1559_v59 = vmul.f32 %v1543_v21, %v3520_v56  ;;  %v1550_v47 = vmul.f32 %v2212_v1, %v4006_v57  ;;  %v1512_v3 = vadd.f32 1e-06, %v1496_v25  ;;  %v2220_v54 = vpop.eup %2219  ;;  %v4009_v1 = vld [vmem:[#allocation37_spill] sm:$0xff] }
 0x2be   :  { %v1572_v50 = vadd.f32 %v1556_v46, %v3529_v42  ;;  %v1573_v5 = vadd.f32 %v1557_v12, %v3529_v42  ;;  %v1580_v19 = vadd.f32 %v1564_v39, %v3529_v42  ;;  %v1581_v14 = vadd.f32 %v1565_v43, %v3529_v42  ;;  %v2222_v12 = vpop.eup %2221 }
 0x2bf   :  { %v1566_v28 = vmul.f32 %v1550_v47, %v3520_v56  ;;  %v1567_v32 = vmul.f32 %v1551_v35, %v3520_v56  ;;  %v1016_v10 = vmul.f32 %v2216_v53, %v4008_v26  ;;  %v1574_v21 = vadd.f32 %v1558_v45, %v3529_v42  ;;  %v2224_v16 = vpop.eup %2223 }
 0x2c0   :  { %v2042_v49 = vpack.c.bf16 %v1572_v50, %v1572_v50  ;;  %v2043_v18 = vpack.c.bf16 %v1573_v5, %v1573_v5  ;;  %v2050_v52 = vpack.c.bf16 %v1580_v19, %v1580_v19  ;;  %v2051_v29 = vpack.c.bf16 %v1581_v14, %v1581_v14  ;;  %v2226_v14 = vpop.eup %2225 }
 0x2c1   :  { %v1575_v51 = vadd.f32 %v1559_v59, %v3529_v42  ;;  %v1031_v46 = vmul.f32 %v3234_v30, %v1015_v55  ;;  %2229 = vrsqrt.f32 %v1512_v3  ;;  %v1498_v39 = vmul.f32 0.25, %v3502_v2  ;;  %v2228_v55 = vpop.eup %2227 }
 0x2c2   :  { %1652 = vrot.lane.b32.xlu0 %v2042_v49, %s2337_s14  ;;  %1654 = vrot.lane.b32.xlu1 %v2043_v18, %s2337_s14  ;;  %v1023_v8 = vmul.f32 %v2218_v44, %v4009_v1  ;;  %2231 = vrsqrt.f32 %v1513_v38  ;;  %v1520_v43 = vadd.f32 1e-06, %v1504_v33  ;;  %v1032_v23 = vmul.f32 %v3234_v30, %v1016_v10  ;;  %v4011_v18 = vld [vmem:[#allocation40_spill] sm:$0xff]  ;;  %v2173_v44 = vld [vmem:[%s3826_s3] sm:$0xff]  }
 0x2c3   :  { %v1024_v15 = vmul.f32 %v2220_v54, %v4010_v40  ;;  %v2044_v25 = vpack.c.bf16 %v1574_v21, %v1574_v21  ;;  %v2045_v50 = vpack.c.bf16 %v1575_v51, %v1575_v51  ;;  %v1582_v5 = vadd.f32 %v1566_v28, %v3529_v42  ;;  %v4013_v54 = vld [vmem:[#allocation43_spill] sm:$0xff]  ;;  %2067 = vmatprep.subr.bf16.mxu0 %v2173_v44 }
 0x2c4   :  { %v1583_v45 = vadd.f32 %v1567_v32, %v3529_v42  ;;  %v1515_v2 = vadd.f32 1e-06, %v1499_v6  ;;  %v1047_v59 = vadd.f32 %v3242_v0, %v1031_v46  ;;  %2233 = vrsqrt.f32 %v1521_v62  ;;  %2085 = vmatprep.subr.bf16.mxu1 %v2173_v44  ;;  %v4014_v6 = vld [vmem:[#allocation42_spill] sm:$0xff]  ;;  %2068 = vmatpush3.bf16.msra.mxu0 %v2173_v44 }
 0x2c5   :  { %v1514_v53 = vadd.f32 1e-06, %v1498_v39  ;;  %v1507_v49 = vmul.f32 0.25, %v3509_v11  ;;  %v1018_v19 = vmul.f32 %v2222_v12, %v4011_v18  ;;  %2235 = vrsqrt.f32 %v1520_v43  ;;  %2086 = vmatpush3.bf16.msra.mxu1 %v2173_v44 }
 0x2c6   :  { %1668 = vrot.lane.b32.xlu0 %v2050_v52, %s2337_s14  ;;  %1670 = vrot.lane.b32.xlu1 %v2051_v29, %s2337_s14  ;;  %v1506_v57 = vmul.f32 0.25, %v3511_v9  ;;  %v1039_v47 = vmul.f32 %v3234_v30, %v1023_v8  ;;  %v1017_v35 = vmul.f32 %v2224_v16, %v4012_v17  ;;  %v2052_v38 = vpack.c.bf16 %v1582_v5, %v1582_v5  ;;  %v4015_v8 = vld [vmem:[#allocation13_spill] sm:$0xff]  ;;  %v4018_v17 = vld [vmem:[#allocation15_spill] sm:$0xff] }
 0x2c7   :  { %v2053_v3 = vpack.c.bf16 %v1583_v45, %v1583_v45  ;;  %v1048_v13 = vadd.f32 %v3242_v0, %v1032_v23  ;;  %v1040_v11 = vmul.f32 %v3234_v30, %v1024_v15  ;;  %2237 = vrsqrt.f32 %v1515_v2 }
 0x2c8   :  { %2239 = vrsqrt.f32 %v1514_v53  ;;  %v1523_v33 = vadd.f32 1e-06, %v1507_v49  ;;  %v2030_v9 = vpack.c.bf16 %v1047_v59, %v1047_v59  ;;  %v1034_v28 = vmul.f32 %v3234_v30, %v1018_v19 }
 0x2c9   :  { %v1522_v32 = vadd.f32 1e-06, %v1506_v57  ;;  %v1055_v26 = vadd.f32 %v3242_v0, %v1039_v47  ;;  %v1033_v10 = vmul.f32 %v3234_v30, %v1017_v35  ;;  %v1025_v52 = vmul.f32 %v2228_v55, %v4013_v54  ;;  %v4017_v57 = vld [vmem:[#allocation16_spill] sm:$0xff] }
 0x2ca   :  { %1656 = vrot.lane.b32.xlu0 %v2044_v25, %s2337_s14  ;;  %1658 = vrot.lane.b32.xlu1 %v2045_v50, %s2337_s14  ;;  %v2031_v21 = vpack.c.bf16 %v1048_v13, %v1048_v13  ;;  %v1056_v51 = vadd.f32 %v3242_v0, %v1040_v11  ;;  %v1026_v46 = vmul.f32 %v2226_v14, %v4014_v6  ;;  %2241 = vrsqrt.f32 %v1523_v33  ;;  %v4016_v25 = vld [vmem:[#allocation14_spill] sm:$0xff]  ;;  %v4020_v11 = vld [vmem:[#allocation17_spill] sm:$0xff] }
 0x2cb   :  { %v2230_v29 = vpop.eup %2229  ;;  %v1050_v62 = vadd.f32 %v3242_v0, %v1034_v28  ;;  %2243 = vrsqrt.f32 %v1522_v32  ;;  %v1049_v39 = vadd.f32 %v3242_v0, %v1033_v10  ;;  %v1041_v1 = vmul.f32 %v3234_v30, %v1025_v52 }
 0x2cc   :  { %v2232_v12 = vpop.eup %2231  ;;  %v1544_v16 = vmul.f32 %v2230_v29, %v4015_v8  ;;  %v2038_v23 = vpack.c.bf16 %v1055_v26, %v1055_v26  ;;  %v2039_v40 = vpack.c.bf16 %v1056_v51, %v1056_v51  ;;  %v1042_v15 = vmul.f32 %v3234_v30, %v1026_v46 }
 0x2cd   :  { %v1545_v50 = vmul.f32 %v2232_v12, %v4016_v25  ;;  %v2032_v2 = vpack.c.bf16 %v1049_v39, %v1049_v39  ;;  %v2033_v59 = vpack.c.bf16 %v1050_v62, %v1050_v62  ;;  %v1057_v53 = vadd.f32 %v3242_v0, %v1041_v1  ;;  %v4022_v62 = vld [vmem:[#allocation20_spill] sm:$0xff] }
 0x2ce   :  { %1672 = vrot.lane.b32.xlu0 %v2052_v38, %s2337_s14  ;;  %1674 = vrot.lane.b32.xlu1 %v2053_v3, %s2337_s14  ;;  %v2234_v43 = vpop.eup %2233  ;;  %v1560_v49 = vmul.f32 %v1544_v16, %v3520_v56  ;;  %v1058_v19 = vadd.f32 %v3242_v0, %v1042_v15  ;;  %v4019_v3 = vld [vmem:[#allocation18_spill] sm:$0xff] }
 0x2cf   :  { %v2236_v5 = vpop.eup %2235  ;;  %v1561_v14 = vmul.f32 %v1545_v50, %v3520_v56  ;;  %v1553_v35 = vmul.f32 %v2234_v43, %v4018_v17  ;;  %v2040_v55 = vpack.c.bf16 %v1057_v53, %v1057_v53 }
 0x2d0   :  { %v1552_v47 = vmul.f32 %v2236_v5, %v4017_v57  ;;  %v1576_v38 = vadd.f32 %v1560_v49, %v3529_v42 }
 0x2d1   :  { %v2238_v45 = vpop.eup %2237  ;;  %v1577_v28 = vadd.f32 %v1561_v14, %v3529_v42  ;;  %v1569_v26 = vmul.f32 %v1553_v35, %v3520_v56 }
 0x2d2   :  { %1131 = vrot.lane.b32.xlu0 %v2030_v9, %s2337_s14  ;;  %1133 = vrot.lane.b32.xlu1 %v2031_v21, %s2337_s14  ;;  %v2240_v18 = vpop.eup %2239  ;;  %v1547_v44 = vmul.f32 %v2238_v45, %v4020_v11  ;;  %v2041_v9 = vpack.c.bf16 %v1058_v19, %v1058_v19  ;;  %v1568_v32 = vmul.f32 %v1552_v47, %v3520_v56  ;;  %v4021_v21 = vld [vmem:[#allocation19_spill] sm:$0xff] }
 0x2d3   :  { %v1546_v13 = vmul.f32 %v2240_v18, %v4019_v3  ;;  %v2046_v54 = vpack.c.bf16 %v1576_v38, %v1576_v38  ;;  %v2047_v6 = vpack.c.bf16 %v1577_v28, %v1577_v28  ;;  %v1585_v12 = vadd.f32 %v1569_v26, %v3529_v42 }
 0x2d4   :  { %v2242_v33 = vpop.eup %2241  ;;  %v1563_v29 = vmul.f32 %v1547_v44, %v3520_v56  ;;  %v1584_v46 = vadd.f32 %v1568_v32, %v3529_v42 }
 0x2d5   :  { %v2244_v10 = vpop.eup %2243  ;;  %v1562_v52 = vmul.f32 %v1546_v13, %v3520_v56  ;;  %v1555_v51 = vmul.f32 %v2242_v33, %v4021_v21  ;;  %v2055_v43 = vpack.c.bf16 %v1585_v12, %v1585_v12 }
 0x2d6   :  { %1147 = vrot.lane.b32.xlu0 %v2038_v23, %s2337_s14  ;;  %1149 = vrot.lane.b32.xlu1 %v2039_v40, %s2337_s14  ;;  %v1554_v39 = vmul.f32 %v2244_v10, %v4022_v62  ;;  %v1579_v8 = vadd.f32 %v1563_v29, %v3529_v42  ;;  %v2054_v16 = vpack.c.bf16 %v1584_v46, %v1584_v46 }
 0x2d7   :  { %v1578_v1 = vadd.f32 %v1562_v52, %v3529_v42  ;;  %v1571_v40 = vmul.f32 %v1555_v51, %v3520_v56 }
 0x2d8   :  { %v1570_v23 = vmul.f32 %v1554_v39, %v3520_v56  ;;  %v2049_v25 = vpack.c.bf16 %v1579_v8, %v1579_v8 }
 0x2d9   :  { %v2048_v15 = vpack.c.bf16 %v1578_v1, %v1578_v1  ;;  %v1587_v5 = vadd.f32 %v1571_v40, %v3529_v42 }
 0x2da   :  { %1135 = vrot.lane.b32.xlu0 %v2032_v2, %s2337_s14  ;;  %1137 = vrot.lane.b32.xlu1 %v2033_v59, %s2337_s14  ;;  %v1586_v50 = vadd.f32 %v1570_v23, %v3529_v42 }
 0x2db   :  { %v2057_v49 = vpack.c.bf16 %v1587_v5, %v1587_v5 }
 0x2dc   :  { %v2056_v53 = vpack.c.bf16 %v1586_v50, %v1586_v50 }
 0x2de   :  { %1151 = vrot.lane.b32.xlu0 %v2040_v55, %s2337_s14  ;;  %1153 = vrot.lane.b32.xlu1 %v2041_v9, %s2337_s14 }
 0x2e2   :  { %1660 = vrot.lane.b32.xlu0 %v2046_v54, %s2337_s14  ;;  %1662 = vrot.lane.b32.xlu1 %v2047_v6, %s2337_s14 }
 0x2e6   :  { %1676 = vrot.lane.b32.xlu0 %v2054_v16, %s2337_s14  ;;  %1678 = vrot.lane.b32.xlu1 %v2055_v43, %s2337_s14 }
 0x2ea   :  { %1664 = vrot.lane.b32.xlu0 %v2048_v15, %s2337_s14  ;;  %1666 = vrot.lane.b32.xlu1 %v2049_v25, %s2337_s14 }
 0x2eb   :  { %v163_v45 = vpop.xlane.xlu0 %162 }
 0x2ec   :  { %v207_v2 = vmul.f32 0.25, %v163_v45  ;;  %v160_v59 = vpop.xlane.xlu1 %159 }
 0x2ed   :  { %v206_v18 = vmul.f32 0.25, %v160_v59 }
 0x2ee   :  { %v223_v19 = vadd.f32 1e-06, %v207_v2  ;;  %1680 = vrot.lane.b32.xlu0 %v2056_v53, %s2337_s14  ;;  %1682 = vrot.lane.b32.xlu1 %v2057_v49, %s2337_s14 }
 0x2ef   :  { %v222_v14 = vadd.f32 1e-06, %v206_v18  ;;  %v187_v57 = vpop.xlane.xlu0 %186 }
 0x2f0   :  { %2245 = vrsqrt.f32 %v223_v19  ;;  %v215_v47 = vmul.f32 0.25, %v187_v57  ;;  %v184_v17 = vpop.xlane.xlu1 %183 }
 0x2f1   :  { %2247 = vrsqrt.f32 %v222_v14  ;;  %v214_v35 = vmul.f32 0.25, %v184_v17 }
 0x2f2   :  { %v231_v55 = vadd.f32 1e-06, %v215_v47  ;;  %v3649_v47 = vld [vmem:[%s3825_s2] ss:$0 sm:$0xff] }
 0x2f3   :  { %v230_v38 = vadd.f32 1e-06, %v214_v35  ;;  %v169_v3 = vpop.xlane.xlu0 %168 }
 0x2f4   :  { %2249 = vrsqrt.f32 %v231_v55  ;;  %v209_v13 = vmul.f32 0.25, %v169_v3  ;;  %v166_v11 = vpop.xlane.xlu1 %165 }
 0x2f5   :  { %2251 = vrsqrt.f32 %v230_v38  ;;  %v208_v44 = vmul.f32 0.25, %v166_v11 }
 0x2f6   :  { %v225_v33 = vadd.f32 1e-06, %v209_v13 }
 0x2f7   :  { %v224_v9 = vadd.f32 1e-06, %v208_v44  ;;  %v193_v28 = vpop.xlane.xlu0 %192 }
 0x2f8   :  { %2253 = vrsqrt.f32 %v225_v33  ;;  %v217_v32 = vmul.f32 0.25, %v193_v28  ;;  %v190_v26 = vpop.xlane.xlu1 %189 }
 0x2f9   :  { %2255 = vrsqrt.f32 %v224_v9  ;;  %v216_v10 = vmul.f32 0.25, %v190_v26 }
 0x2fa   :  { %v2246_v54 = vpop.eup %2245  ;;  %v233_v52 = vadd.f32 1e-06, %v217_v32 }
 0x2fb   :  { %v2248_v29 = vpop.eup %2247  ;;  %v255_v21 = vmul.f32 %v2246_v54, %v3262_v24  ;;  %v232_v51 = vadd.f32 1e-06, %v216_v10  ;;  %v608_v6 = vpop.xlane.xlu0 %607 }
 0x2fc   :  { %v254_v46 = vmul.f32 %v2248_v29, %v3266_v20  ;;  %2257 = vrsqrt.f32 %v233_v52  ;;  %v652_v12 = vmul.f32 0.25, %v608_v6  ;;  %v605_v62 = vpop.xlane.xlu1 %604 }
 0x2fd   :  { %2259 = vrsqrt.f32 %v232_v51  ;;  %v651_v39 = vmul.f32 0.25, %v605_v62  ;;  %v277_v1 = vmul.f32 %v3234_v30, %v255_v21 }
 0x2fe   :  { %v2250_v8 = vpop.eup %2249  ;;  %v668_v16 = vadd.f32 1e-06, %v652_v12  ;;  %v276_v43 = vmul.f32 %v3234_v30, %v254_v46  ;;  %v3640_v30 = vld [vmem:[%s3824_s1] ss:$0 sm:$0xff] }
 0x2ff   :  { %v2252_v23 = vpop.eup %2251  ;;  %v263_v40 = vmul.f32 %v2250_v8, %v3273_v41  ;;  %v667_v15 = vadd.f32 1e-06, %v651_v39  ;;  %v632_v24 = vpop.xlane.xlu0 %631  ;;  %v299_v25 = vadd.f32 %v3242_v0, %v277_v1 }
 0x300   :  { %v262_v20 = vmul.f32 %v2252_v23, %v3279_v37  ;;  %2261 = vrsqrt.f32 %v668_v16  ;;  %v660_v50 = vmul.f32 0.25, %v632_v24  ;;  %v629_v5 = vpop.xlane.xlu1 %628  ;;  %v298_v45 = vadd.f32 %v3242_v0, %v276_v43  ;;  %v4023_v16 = vld [vmem:[#allocation22_spill] sm:$0xff] }
 0x301   :  { %2263 = vrsqrt.f32 %v667_v15  ;;  %v659_v2 = vmul.f32 0.25, %v629_v5  ;;  %v315_v59 = vpack.c.bf16 %v299_v25, %v299_v25  ;;  %v285_v41 = vmul.f32 %v3640_v30, %v263_v40  ;;  %v4024_v15 = vld [vmem:[#allocation21_spill] sm:$0xff] }
 0x302   :  { %v2254_v53 = vpop.eup %2253  ;;  %v676_v49 = vadd.f32 1e-06, %v660_v50  ;;  %v314_v18 = vpack.c.bf16 %v298_v45, %v298_v45  ;;  %v284_v37 = vmul.f32 %v3640_v30, %v262_v20 }
 0x303   :  { %v2256_v19 = vpop.eup %2255  ;;  %v257_v14 = vmul.f32 %v2254_v53, %v3290_v34  ;;  %v675_v57 = vadd.f32 1e-06, %v659_v2  ;;  %v614_v0 = vpop.xlane.xlu0 %613  ;;  %332 = vst.msk [vmem:[#allocation2 + $0x4] sm:$0xf] %vm330_vm1, %v315_v59  ;;  %v307_v17 = vadd.f32 %v3649_v47, %v285_v41 }
 0x304   :  { %v256_v35 = vmul.f32 %v2256_v19, %v3297_v36  ;;  %2265 = vrsqrt.f32 %v676_v49  ;;  %v654_v55 = vmul.f32 0.25, %v614_v0  ;;  %v611_v38 = vpop.xlane.xlu1 %610  ;;  %331 = vst.msk [vmem:[#allocation2] sm:$0xf] %vm330_vm1, %v314_v18  ;;  %v306_v34 = vadd.f32 %v3649_v47, %v284_v37  ;;  %v4025_v37 = vld [vmem:[#allocation24_spill] sm:$0xff] }
 0x305   :  { %2267 = vrsqrt.f32 %v675_v57  ;;  %v653_v3 = vmul.f32 0.25, %v611_v38  ;;  %v323_v13 = vpack.c.bf16 %v307_v17, %v307_v17  ;;  %v279_v11 = vmul.f32 %v3640_v30, %v257_v14  ;;  %v4026_v17 = vld [vmem:[#allocation23_spill] sm:$0xff] }
 0x306   :  { %v2258_v44 = vpop.eup %2257  ;;  %v670_v33 = vadd.f32 1e-06, %v654_v55  ;;  %v278_v9 = vmul.f32 %v3640_v30, %v256_v35  ;;  %v322_v28 = vpack.c.bf16 %v306_v34, %v306_v34 }
 0x307   :  { %v2260_v32 = vpop.eup %2259  ;;  %v265_v36 = vmul.f32 %v2258_v44, %v3307_v27  ;;  %v669_v26 = vadd.f32 1e-06, %v653_v3  ;;  %v638_v10 = vpop.xlane.xlu0 %637  ;;  %340 = vst.msk [vmem:[#allocation2 + $0x24] sm:$0xf] %vm330_vm1, %v323_v13  ;;  %v301_v54 = vadd.f32 %v3649_v47, %v279_v11 }
 0x308   :  { %v264_v52 = vmul.f32 %v2260_v32, %v3314_v31  ;;  %2269 = vrsqrt.f32 %v670_v33  ;;  %v662_v29 = vmul.f32 0.25, %v638_v10  ;;  %v635_v21 = vpop.xlane.xlu1 %634  ;;  %v300_v51 = vadd.f32 %v3649_v47, %v278_v9  ;;  %339 = vst.msk [vmem:[#allocation2 + $0x20] sm:$0xf] %vm330_vm1, %v322_v28 }
 0x309   :  { %2271 = vrsqrt.f32 %v669_v26  ;;  %v661_v6 = vmul.f32 0.25, %v635_v21  ;;  %v317_v46 = vpack.c.bf16 %v301_v54, %v301_v54  ;;  %v287_v27 = vmul.f32 %v3640_v30, %v265_v36  ;;  %v4027_v36 = vld [vmem:[#allocation26_spill] sm:$0xff] }
 0x30a   :  { %v2262_v12 = vpop.eup %2261  ;;  %v678_v62 = vadd.f32 1e-06, %v662_v29  ;;  %v316_v39 = vpack.c.bf16 %v300_v51, %v300_v51  ;;  %v286_v1 = vmul.f32 %v3640_v30, %v264_v52  ;;  %v4028_v29 = vld [vmem:[#allocation25_spill] sm:$0xff] }
 0x30b   :  { %v2264_v8 = vpop.eup %2263  ;;  %v700_v31 = vmul.f32 %v2262_v12, %v4023_v16  ;;  %v677_v43 = vadd.f32 1e-06, %v661_v6  ;;  %v175_v23 = vpop.xlane.xlu0 %174  ;;  %334 = vst.msk [vmem:[#allocation2 + $0xc] sm:$0xf] %vm330_vm1, %v317_v46  ;;  %v309_v40 = vadd.f32 %v3649_v47, %v287_v27 }
 0x30c   :  { %v699_v24 = vmul.f32 %v2264_v8, %v4024_v15  ;;  %2273 = vrsqrt.f32 %v678_v62  ;;  %v211_v25 = vmul.f32 0.25, %v175_v23  ;;  %v172_v20 = vpop.xlane.xlu1 %171  ;;  %333 = vst.msk [vmem:[#allocation2 + $0x8] sm:$0xf] %vm330_vm1, %v316_v39  ;;  %v308_v50 = vadd.f32 %v3649_v47, %v286_v1 }
 0x30d   :  { %2275 = vrsqrt.f32 %v677_v43  ;;  %v210_v5 = vmul.f32 0.25, %v172_v20  ;;  %v719_v45 = vmul.f32 %v3520_v56, %v700_v31  ;;  %v325_v2 = vpack.c.bf16 %v309_v40, %v309_v40  ;;  %v4029_v43 = vld [vmem:[#allocation28_spill] sm:$0xff] }
 0x30e   :  { %v2266_v59 = vpop.eup %2265  ;;  %v227_v41 = vadd.f32 1e-06, %v211_v25  ;;  %v718_v53 = vmul.f32 %v3520_v56, %v699_v24  ;;  %v324_v49 = vpack.c.bf16 %v308_v50, %v308_v50  ;;  %v4030_v25 = vld [vmem:[#allocation27_spill] sm:$0xff] }
 0x30f   :  { %v2268_v18 = vpop.eup %2267  ;;  %v708_v19 = vmul.f32 %v2266_v59, %v4025_v37  ;;  %v226_v14 = vadd.f32 1e-06, %v210_v5  ;;  %v199_v57 = vpop.xlane.xlu0 %198  ;;  %v738_v0 = vadd.f32 %v3529_v42, %v719_v45  ;;  %342 = vst.msk [vmem:[#allocation2 + $0x2c] sm:$0xf] %vm330_vm1, %v325_v2 }
 0x310   :  { %v707_v35 = vmul.f32 %v2268_v18, %v4026_v17  ;;  %2277 = vrsqrt.f32 %v227_v41  ;;  %v219_v55 = vmul.f32 0.25, %v199_v57  ;;  %v196_v38 = vpop.xlane.xlu1 %195  ;;  %v737_v34 = vadd.f32 %v3529_v42, %v718_v53  ;;  %341 = vst.msk [vmem:[#allocation2 + $0x28] sm:$0xf] %vm330_vm1, %v324_v49 }
 0x311   :  { %2279 = vrsqrt.f32 %v226_v14  ;;  %v218_v3 = vmul.f32 0.25, %v196_v38  ;;  %v754_v13 = vpack.c.bf16 %v738_v0, %v738_v0  ;;  %v727_v11 = vmul.f32 %v3520_v56, %v708_v19 }
 0x312   :  { %v2270_v44 = vpop.eup %2269  ;;  %v235_v33 = vadd.f32 1e-06, %v219_v55  ;;  %v753_v9 = vpack.c.bf16 %v737_v34, %v737_v34  ;;  %v726_v28 = vmul.f32 %v3520_v56, %v707_v35 }
 0x313   :  { %v2272_v32 = vpop.eup %2271  ;;  %v702_v26 = vmul.f32 %v2270_v44, %v4027_v36  ;;  %v234_v10 = vadd.f32 1e-06, %v218_v3  ;;  %v181_v54 = vpop.xlane.xlu0 %180  ;;  %771 = vst.msk [vmem:[#allocation2 + $0x4] sm:$0xf] %vm769_vm2, %v754_v13  ;;  %v746_v52 = vadd.f32 %v3529_v42, %v727_v11 }
 0x314   :  { %v701_v21 = vmul.f32 %v2272_v32, %v4028_v29  ;;  %2281 = vrsqrt.f32 %v235_v33  ;;  %v213_v51 = vmul.f32 0.25, %v181_v54  ;;  %v178_v6 = vpop.xlane.xlu1 %177  ;;  %770 = vst.msk [vmem:[#allocation2] sm:$0xf] %vm769_vm2, %v753_v9  ;;  %v745_v46 = vadd.f32 %v3529_v42, %v726_v28 }
 0x315   :  { %2283 = vrsqrt.f32 %v234_v10  ;;  %v212_v27 = vmul.f32 0.25, %v178_v6  ;;  %v762_v12 = vpack.c.bf16 %v746_v52, %v746_v52  ;;  %v721_v62 = vmul.f32 %v3520_v56, %v702_v26 }
 0x316   :  { %v2274_v39 = vpop.eup %2273  ;;  %v229_v1 = vadd.f32 1e-06, %v213_v51  ;;  %v720_v8 = vmul.f32 %v3520_v56, %v701_v21  ;;  %v761_v16 = vpack.c.bf16 %v745_v46, %v745_v46 }
 0x317   :  { %v2276_v31 = vpop.eup %2275  ;;  %v710_v23 = vmul.f32 %v2274_v39, %v4029_v43  ;;  %v228_v40 = vadd.f32 1e-06, %v212_v27  ;;  %v205_v15 = vpop.xlane.xlu0 %204  ;;  %779 = vst.msk [vmem:[#allocation2 + $0x24] sm:$0xf] %vm769_vm2, %v762_v12  ;;  %v740_v24 = vadd.f32 %v3529_v42, %v721_v62 }
 0x318   :  { %v709_v20 = vmul.f32 %v2276_v31, %v4030_v25  ;;  %2285 = vrsqrt.f32 %v229_v1  ;;  %v221_v50 = vmul.f32 0.25, %v205_v15  ;;  %v202_v5 = vpop.xlane.xlu1 %201  ;;  %v739_v45 = vadd.f32 %v3529_v42, %v720_v8  ;;  %778 = vst.msk [vmem:[#allocation2 + $0x20] sm:$0xf] %vm769_vm2, %v761_v16 }
 0x319   :  { %2287 = vrsqrt.f32 %v228_v40  ;;  %v220_v2 = vmul.f32 0.25, %v202_v5  ;;  %v756_v59 = vpack.c.bf16 %v740_v24, %v740_v24  ;;  %v729_v41 = vmul.f32 %v3520_v56, %v710_v23 }
 0x31a   :  { %v2278_v53 = vpop.eup %2277  ;;  %v237_v49 = vadd.f32 1e-06, %v221_v50  ;;  %v755_v18 = vpack.c.bf16 %v739_v45, %v739_v45  ;;  %v728_v37 = vmul.f32 %v3520_v56, %v709_v20 }
 0x31b   :  { %v2280_v19 = vpop.eup %2279  ;;  %v259_v14 = vmul.f32 %v2278_v53, %v3351_v7  ;;  %v236_v57 = vadd.f32 1e-06, %v220_v2  ;;  %v620_v0 = vpop.xlane.xlu0 %619  ;;  %773 = vst.msk [vmem:[#allocation2 + $0xc] sm:$0xf] %vm769_vm2, %v756_v59  ;;  %v748_v17 = vadd.f32 %v3529_v42, %v729_v41 }
 0x31c   :  { %v258_v35 = vmul.f32 %v2280_v19, %v3358_v22  ;;  %2289 = vrsqrt.f32 %v237_v49  ;;  %v656_v55 = vmul.f32 0.25, %v620_v0  ;;  %v617_v38 = vpop.xlane.xlu1 %616  ;;  %772 = vst.msk [vmem:[#allocation2 + $0x8] sm:$0xf] %vm769_vm2, %v755_v18  ;;  %v747_v34 = vadd.f32 %v3529_v42, %v728_v37 }
 0x31d   :  { %2291 = vrsqrt.f32 %v236_v57  ;;  %v655_v3 = vmul.f32 0.25, %v617_v38  ;;  %v764_v13 = vpack.c.bf16 %v748_v17, %v748_v17  ;;  %v281_v7 = vmul.f32 %v3640_v30, %v259_v14 }
 0x31e   :  { %v2282_v11 = vpop.eup %2281  ;;  %v672_v44 = vadd.f32 1e-06, %v656_v55  ;;  %v763_v33 = vpack.c.bf16 %v747_v34, %v747_v34  ;;  %v280_v9 = vmul.f32 %v3640_v30, %v258_v35  ;;  %v4031_v55 = vld [vmem:[#allocation30_spill] sm:$0xff] }
 0x31f   :  { %v2284_v28 = vpop.eup %2283  ;;  %v267_v22 = vmul.f32 %v2282_v11, %v3367_v63  ;;  %v671_v32 = vadd.f32 1e-06, %v655_v3  ;;  %v644_v36 = vpop.xlane.xlu0 %643  ;;  %781 = vst.msk [vmem:[#allocation2 + $0x2c] sm:$0xf] %vm769_vm2, %v764_v13  ;;  %v303_v26 = vadd.f32 %v3649_v47, %v281_v7  ;;  %v4032_v13 = vld [vmem:[#allocation29_spill] sm:$0xff] }
 0x320   :  { %v266_v10 = vmul.f32 %v2284_v28, %v3376_v60  ;;  %2293 = vrsqrt.f32 %v672_v44  ;;  %v664_v54 = vmul.f32 0.25, %v644_v36  ;;  %v641_v52 = vpop.xlane.xlu1 %640  ;;  %780 = vst.msk [vmem:[#allocation2 + $0x28] sm:$0xf] %vm769_vm2, %v763_v33  ;;  %v302_v29 = vadd.f32 %v3649_v47, %v280_v9  ;;  %v4033_v36 = vld [vmem:[#allocation32_spill] sm:$0xff] }
 0x321   :  { %2295 = vrsqrt.f32 %v671_v32  ;;  %v663_v21 = vmul.f32 0.25, %v641_v52  ;;  %v319_v51 = vpack.c.bf16 %v303_v26, %v303_v26  ;;  %v289_v63 = vmul.f32 %v3640_v30, %v267_v22  ;;  %v4034_v52 = vld [vmem:[#allocation31_spill] sm:$0xff] }
 0x322   :  { %v2286_v6 = vpop.eup %2285  ;;  %v680_v46 = vadd.f32 1e-06, %v664_v54  ;;  %v318_v27 = vpack.c.bf16 %v302_v29, %v302_v29  ;;  %v288_v12 = vmul.f32 %v3640_v30, %v266_v10 }
 0x323   :  { %v2288_v62 = vpop.eup %2287  ;;  %v261_v60 = vmul.f32 %v2286_v6, %v3387_v4  ;;  %v679_v39 = vadd.f32 1e-06, %v663_v21  ;;  %v626_v1 = vpop.xlane.xlu0 %625  ;;  %336 = vst.msk [vmem:[#allocation2 + $0x14] sm:$0xf] %vm330_vm1, %v319_v51  ;;  %v311_v8 = vadd.f32 %v3649_v47, %v289_v63 }
 0x324   :  { %v260_v16 = vmul.f32 %v2288_v62, %v3395_v48  ;;  %2297 = vrsqrt.f32 %v680_v46  ;;  %v658_v31 = vmul.f32 0.25, %v626_v1  ;;  %v623_v43 = vpop.xlane.xlu1 %622  ;;  %335 = vst.msk [vmem:[#allocation2 + $0x10] sm:$0xf] %vm330_vm1, %v318_v27  ;;  %v310_v23 = vadd.f32 %v3649_v47, %v288_v12  ;;  %v4035_v62 = vld [vmem:[#allocation34_spill] sm:$0xff] }
 0x325   :  { %2299 = vrsqrt.f32 %v679_v39  ;;  %v657_v40 = vmul.f32 0.25, %v623_v43  ;;  %v327_v15 = vpack.c.bf16 %v311_v8, %v311_v8  ;;  %v283_v4 = vmul.f32 %v3640_v30, %v261_v60  ;;  %v4036_v8 = vld [vmem:[#allocation33_spill] sm:$0xff] }
 0x326   :  { %v2290_v24 = vpop.eup %2289  ;;  %v674_v25 = vadd.f32 1e-06, %v658_v31  ;;  %v326_v20 = vpack.c.bf16 %v310_v23, %v310_v23  ;;  %v282_v50 = vmul.f32 %v3640_v30, %v260_v16 }
 0x327   :  { %v2292_v5 = vpop.eup %2291  ;;  %v269_v48 = vmul.f32 %v2290_v24, %v3405_v61  ;;  %v673_v45 = vadd.f32 1e-06, %v657_v40  ;;  %v650_v2 = vpop.xlane.xlu0 %649  ;;  %344 = vst.msk [vmem:[#allocation2 + $0x34] sm:$0xf] %vm330_vm1, %v327_v15  ;;  %v305_v59 = vadd.f32 %v3649_v47, %v283_v4 }
 0x328   :  { %v268_v41 = vmul.f32 %v2292_v5, %v3412_v58  ;;  %2301 = vrsqrt.f32 %v674_v25  ;;  %v666_v53 = vmul.f32 0.25, %v650_v2  ;;  %v647_v49 = vpop.xlane.xlu1 %646  ;;  %343 = vst.msk [vmem:[#allocation2 + $0x30] sm:$0xf] %vm330_vm1, %v326_v20  ;;  %v304_v18 = vadd.f32 %v3649_v47, %v282_v50  ;;  %v4037_v20 = vld [vmem:[#allocation36_spill] sm:$0xff] }
 0x329   :  { %2303 = vrsqrt.f32 %v673_v45  ;;  %v665_v37 = vmul.f32 0.25, %v647_v49  ;;  %v321_v19 = vpack.c.bf16 %v305_v59, %v305_v59  ;;  %v291_v61 = vmul.f32 %v3640_v30, %v269_v48  ;;  %v4038_v45 = vld [vmem:[#allocation35_spill] sm:$0xff] }
 0x32a   :  { %v2294_v14 = vpop.eup %2293  ;;  %v682_v57 = vadd.f32 1e-06, %v666_v53  ;;  %v320_v0 = vpack.c.bf16 %v304_v18, %v304_v18  ;;  %v290_v17 = vmul.f32 %v3640_v30, %v268_v41 }
 0x32b   :  { %v2296_v35 = vpop.eup %2295  ;;  %v704_v58 = vmul.f32 %v2294_v14, %v4031_v55  ;;  %v681_v38 = vadd.f32 1e-06, %v665_v37  ;;  %v1126_v34 = vpop.permute.xlu0 %1125  ;;  %338 = vst.msk [vmem:[#allocation2 + $0x1c] sm:$0xf] %vm330_vm1, %v321_v19  ;;  %v313_v3 = vadd.f32 %v3649_v47, %v291_v61 }
 0x32c   :  { %v703_v7 = vmul.f32 %v2296_v35, %v4032_v13  ;;  %2305 = vrsqrt.f32 %v682_v57  ;;  %1173 = vst.msk [vmem:[#allocation2 + $0x4] sm:$0xf] %vm1171_vm3, %v1126_v34  ;;  %v1124_v11 = vpop.permute.xlu1 %1123  ;;  %v312_v44 = vadd.f32 %v3649_v47, %v290_v17 }
 0x32d   :  { %337 = vst.msk [vmem:[#allocation2 + $0x18] sm:$0xf] %vm330_vm1, %v320_v0  ;;  %2307 = vrsqrt.f32 %v681_v38  ;;  %v723_v30 = vmul.f32 %v3520_v56, %v704_v58  ;;  %v329_v33 = vpack.c.bf16 %v313_v3, %v313_v3 }
 0x32e   :  { %1172 = vst.msk [vmem:[#allocation2] sm:$0xf] %vm1171_vm3, %v1124_v11  ;;  %v2298_v9 = vpop.eup %2297  ;;  %v722_v28 = vmul.f32 %v3520_v56, %v703_v7  ;;  %v328_v22 = vpack.c.bf16 %v312_v44, %v312_v44 }
 0x32f   :  { %v2300_v32 = vpop.eup %2299  ;;  %v712_v26 = vmul.f32 %v2298_v9, %v4033_v36  ;;  %v1128_v10 = vpop.permute.xlu0 %1127  ;;  %v742_v54 = vadd.f32 %v3529_v42, %v723_v30  ;;  %346 = vst.msk [vmem:[#allocation2 + $0x3c] sm:$0xf] %vm330_vm1, %v329_v33 }
 0x330   :  { %v711_v47 = vmul.f32 %v2300_v32, %v4034_v52  ;;  %1174 = vst.msk [vmem:[#allocation2 + $0x8] sm:$0xf] %vm1171_vm3, %v1128_v10  ;;  %v1140_v29 = vpop.permute.xlu1 %1139  ;;  %v741_v21 = vadd.f32 %v3529_v42, %v722_v28 }
 0x331   :  { %345 = vst.msk [vmem:[#allocation2 + $0x38] sm:$0xf] %vm330_vm1, %v328_v22  ;;  %v758_v51 = vpack.c.bf16 %v742_v54, %v742_v54  ;;  %v731_v63 = vmul.f32 %v3520_v56, %v712_v26 }
 0x332   :  { %1180 = vst.msk [vmem:[#allocation2 + $0x20] sm:$0xf] %vm1171_vm3, %v1140_v29  ;;  %v2302_v6 = vpop.eup %2301  ;;  %v757_v46 = vpack.c.bf16 %v741_v21, %v741_v21  ;;  %v730_v27 = vmul.f32 %v3520_v56, %v711_v47 }
 0x333   :  { %v2304_v12 = vpop.eup %2303  ;;  %v706_v60 = vmul.f32 %v2302_v6, %v4035_v62  ;;  %v1144_v39 = vpop.permute.xlu0 %1143  ;;  %775 = vst.msk [vmem:[#allocation2 + $0x14] sm:$0xf] %vm769_vm2, %v758_v51  ;;  %v750_v1 = vadd.f32 %v3529_v42, %v731_v63 }
 0x334   :  { %v705_v16 = vmul.f32 %v2304_v12, %v4036_v8  ;;  %1182 = vst.msk [vmem:[#allocation2 + $0x28] sm:$0xf] %vm1171_vm3, %v1144_v39  ;;  %v1142_v31 = vpop.permute.xlu1 %1141  ;;  %v749_v43 = vadd.f32 %v3529_v42, %v730_v27  ;;  %v2008_v27 = vld [vmem:[%s3827_s4] ss:$0 sm:$0xff]  ;;  %s2338_s4 = smov [#allocation3]  }
 0x335   :  { %774 = vst.msk [vmem:[#allocation2 + $0x10] sm:$0xf] %vm769_vm2, %v757_v46  ;;  %v766_v23 = vpack.c.bf16 %v750_v1, %v750_v1  ;;  %v725_v40 = vmul.f32 %v3520_v56, %v706_v60  ;;  %s1931_s21 = sshll.u32 %s2338_s4, 4  ;;  %s1932_s21 = int_to_ptr.vmem [resolvable:$true] %s1931_s21 }
 0x336   :  { %1181 = vst.msk [vmem:[#allocation2 + $0x24] sm:$0xf] %vm1171_vm3, %v1142_v31  ;;  %v2306_v15 = vpop.eup %2305  ;;  %v765_v4 = vpack.c.bf16 %v749_v43, %v749_v43  ;;  %v724_v24 = vmul.f32 %v3520_v56, %v705_v16  ;;  %s2311_s22 = scalar_lea.vmem %s1932_s21, 2048  ;;  %p2316_p1 = scmp.lt.s32.totalorder %s1932_s21, %s1932_s21 }
 0x337   :  { %v2308_v25 = vpop.eup %2307  ;;  %v714_v50 = vmul.f32 %v2306_v15, %v4037_v20  ;;  %v1653_v5 = vpop.permute.xlu0 %1652  ;;  %783 = vst.msk [vmem:[#allocation2 + $0x34] sm:$0xf] %vm769_vm2, %v766_v23  ;;  %v744_v48 = vadd.f32 %v3529_v42, %v725_v40  ;;  %p2312_p0 = scmp.ne.s32.totalorder %s1932_s21, %s2311_s22  ;;  %p2317_p2 = scmp.lt.s32.totalorder %s2311_s22, %s2311_s22 }
 0x338   :  { %v713_v2 = vmul.f32 %v2308_v25, %v4038_v45  ;;  %1701 = vst.msk [vmem:[#allocation2] sm:$0xf] %vm1700_vm4, %v1653_v5  ;;  %v1130_v59 = vpop.permute.xlu1 %1129  ;;  %v743_v41 = vadd.f32 %v3529_v42, %v724_v24 }
 0x339   :  { %782 = vst.msk [vmem:[#allocation2 + $0x30] sm:$0xf] %vm769_vm2, %v765_v4  ;;  %v760_v53 = vpack.c.bf16 %v744_v48, %v744_v48  ;;  %v733_v49 = vmul.f32 %v3520_v56, %v714_v50  ;;  %p2318_p3 = por %p2317_p2, %p2316_p1 }
 0x33a   :  { %1175 = vst.msk [vmem:[#allocation2 + $0xc] sm:$0xf] %vm1171_vm3, %v1130_v59  ;;  %v759_v18 = vpack.c.bf16 %v743_v41, %v743_v41  ;;  %v732_v37 = vmul.f32 %v3520_v56, %v713_v2 }
 0x33b   :  { %v1669_v19 = vpop.permute.xlu0 %1668  ;;  %777 = vst.msk [vmem:[#allocation2 + $0x1c] sm:$0xf] %vm769_vm2, %v760_v53  ;;  %v752_v61 = vadd.f32 %v3529_v42, %v733_v49  ;;  %p2319_p4 = pnand %p2318_p3, %p2312_p0 }
 0x33c   :  { %1709 = vst.msk [vmem:[#allocation2 + $0x20] sm:$0xf] %vm1700_vm4, %v1669_v19  ;;  %v1146_v14 = vpop.permute.xlu1 %1145  ;;  %v751_v57 = vadd.f32 %v3529_v42, %v732_v37 }
 0x33d   :  { %776 = vst.msk [vmem:[#allocation2 + $0x18] sm:$0xf] %vm769_vm2, %v759_v18  ;;  %v768_v0 = vpack.c.bf16 %v752_v61, %v752_v61 }
 0x33e   :  { %1183 = vst.msk [vmem:[#allocation2 + $0x2c] sm:$0xf] %vm1171_vm3, %v1146_v14  ;;  %v767_v17 = vpack.c.bf16 %v751_v57, %v751_v57 }
 0x33f   :  { %v1657_v35 = vpop.permute.xlu0 %1656  ;;  %785 = vst.msk [vmem:[#allocation2 + $0x3c] sm:$0xf] %vm769_vm2, %v768_v0 }
 0x340   :  { %1703 = vst.msk [vmem:[#allocation2 + $0x8] sm:$0xf] %vm1700_vm4, %v1657_v35  ;;  %v1655_v56 = vpop.permute.xlu1 %1654 }
 0x341   :  { %784 = vst.msk [vmem:[#allocation2 + $0x38] sm:$0xf] %vm769_vm2, %v767_v17 }
 0x342   :  { %1702 = vst.msk [vmem:[#allocation2 + $0x4] sm:$0xf] %vm1700_vm4, %v1655_v56 }
 0x343   :  { %v1673_v55 = vpop.permute.xlu0 %1672 }
 0x344   :  { %1711 = vst.msk [vmem:[#allocation2 + $0x28] sm:$0xf] %vm1700_vm4, %v1673_v55  ;;  %v1671_v58 = vpop.permute.xlu1 %1670 }
 0x345   :  { %1710 = vst.msk [vmem:[#allocation2 + $0x24] sm:$0xf] %vm1700_vm4, %v1671_v58 }
 0x347   :  { %v1132_v42 = vpop.permute.xlu0 %1131 }
 0x348   :  { %1176 = vst.msk [vmem:[#allocation2 + $0x10] sm:$0xf] %vm1171_vm3, %v1132_v42  ;;  %v1659_v38 = vpop.permute.xlu1 %1658 }
 0x349   :  { %v2172_v34 = vld [vmem:[#allocation2] sm:$0xff]   ;;  %1704 = vst.msk [vmem:[#allocation2 + $0xc] sm:$0xf] %vm1700_vm4, %v1659_v38 }
 0x34a   :  { %2069 = vmatprep.mubr.msk.bf16.mxu0 %vm1788_vm5, %v2172_v34 }
 0x34b   :  { %v1148_v3 = vpop.permute.xlu0 %1147 }
 0x34c   :  { %1184 = vst.msk [vmem:[#allocation2 + $0x30] sm:$0xf] %vm1171_vm3, %v1148_v3  ;;  %v1675_v13 = vpop.permute.xlu1 %1674  ;;  %v2174_v7 = vld [vmem:[#allocation2 + $0x20] sm:$0xff]  }
 0x34d   :  { %1712 = vst.msk [vmem:[#allocation2 + $0x2c] sm:$0xf] %vm1700_vm4, %v1675_v13  ;;  %2077 = vmatprep.mubr.msk.bf16.mxu1 %vm1788_vm5, %v2174_v7 }
 0x34f   :  { %v1136_v11 = vpop.permute.xlu0 %1135 }
 0x350   :  { %1178 = vst.msk [vmem:[#allocation2 + $0x18] sm:$0xf] %vm1171_vm3, %v1136_v11  ;;  %v1134_v44 = vpop.permute.xlu1 %1133  ;;  %v2175_v30 = vld [vmem:[#allocation2 + $0x8] sm:$0xff]  }
 0x351   :  { %1177 = vst.msk [vmem:[#allocation2 + $0x14] sm:$0xf] %vm1171_vm3, %v1134_v44  ;;  %2070 = vmatmul.mubr.msk.bf16.vlgmr.msra.gmra.mrb[0].mxu0 %vm1788_vm5, %v2175_v30 }
 0x353   :  { %v1152_v33 = vpop.permute.xlu0 %1151 }
 0x354   :  { %1186 = vst.msk [vmem:[#allocation2 + $0x38] sm:$0xf] %vm1171_vm3, %v1152_v33  ;;  %v1150_v9 = vpop.permute.xlu1 %1149  ;;  %v2176_v28 = vld [vmem:[#allocation2 + $0x28] sm:$0xff]  }
 0x355   :  { %1185 = vst.msk [vmem:[#allocation2 + $0x34] sm:$0xf] %vm1171_vm3, %v1150_v9  ;;  %2078 = vmatmul.mubr.msk.bf16.vlgmr.msra.gmra.mrb[0].mxu1 %vm1788_vm5, %v2176_v28 }
 0x357   :  { %v1661_v22 = vpop.permute.xlu0 %1660 }
 0x358   :  { %1705 = vst.msk [vmem:[#allocation2 + $0x10] sm:$0xf] %vm1700_vm4, %v1661_v22  ;;  %v1138_v32 = vpop.permute.xlu1 %1137 }
 0x359   :  { %1179 = vst.msk [vmem:[#allocation2 + $0x1c] sm:$0xf] %vm1171_vm3, %v1138_v32 }
 0x35b   :  { %v1677_v36 = vpop.permute.xlu0 %1676 }
 0x35c   :  { %1713 = vst.msk [vmem:[#allocation2 + $0x30] sm:$0xf] %vm1700_vm4, %v1677_v36  ;;  %v1154_v26 = vpop.permute.xlu1 %1153 }
 0x35d   :  { %1187 = vst.msk [vmem:[#allocation2 + $0x3c] sm:$0xf] %vm1171_vm3, %v1154_v26 }
 0x35f   :  { %v1665_v10 = vpop.permute.xlu0 %1664 }
 0x360   :  { %1707 = vst.msk [vmem:[#allocation2 + $0x18] sm:$0xf] %vm1700_vm4, %v1665_v10  ;;  %v1663_v54 = vpop.permute.xlu1 %1662 }
 0x361   :  { %1706 = vst.msk [vmem:[#allocation2 + $0x14] sm:$0xf] %vm1700_vm4, %v1663_v54 }
 0x363   :  { %v1681_v52 = vpop.permute.xlu0 %1680 }
 0x364   :  { %1715 = vst.msk [vmem:[#allocation2 + $0x38] sm:$0xf] %vm1700_vm4, %v1681_v52  ;;  %v1679_v47 = vpop.permute.xlu1 %1678 }
 0x365   :  { %1714 = vst.msk [vmem:[#allocation2 + $0x34] sm:$0xf] %vm1700_vm4, %v1679_v47 }
 0x368   :  { %v1667_v29 = vpop.permute.xlu1 %1666  ;;  %v2177_v21 = vld [vmem:[#allocation2 + $0x10] sm:$0xff]  }
 0x369   :  { %1708 = vst.msk [vmem:[#allocation2 + $0x1c] sm:$0xf] %vm1700_vm4, %v1667_v29  ;;  %2073 = vmatprep.mubr.msk.bf16.mxu0 %vm1788_vm5, %v2177_v21 }
 0x36c   :  { %v1683_v51 = vpop.permute.xlu1 %1682  ;;  %v2178_v63 = vld [vmem:[#allocation2 + $0x30] sm:$0xff]  }
 0x36d   :  { %1716 = vst.msk [vmem:[#allocation2 + $0x3c] sm:$0xf] %vm1700_vm4, %v1683_v51  ;;  %2081 = vmatprep.mubr.msk.bf16.mxu1 %vm1788_vm5, %v2178_v63 }
 0x370   :  { %v2179_v6 = vld [vmem:[#allocation2 + $0x18] sm:$0xff]  }
 0x371   :  { %2074 = vmatmul.mubr.msk.bf16.gmra.mrb[4].mxu0 %vm1788_vm5, %v2179_v6 }
 0x374   :  { %v2180_v46 = vld [vmem:[#allocation2 + $0x38] sm:$0xff]  }
 0x375   :  { %2082 = vmatmul.mubr.msk.bf16.gmra.mrb[4].mxu1 %vm1788_vm5, %v2180_v46 }
 0x424   :  { %v2071_v12 = vpop.f32.mrb[0].mxu0 }
 0x425   :  { %v1856_v62 = vadd.f32 %v2071_v12, %v2008_v27  ;;  %v1847_v60 = vpop.f32.mrb[1].mxu0 }
 0x426   :  { %v1848_v39 = vadd.f32 %v2008_v27, %v1847_v60  ;;  %v2072_v1 = vpop.f32.mrb[2].mxu0 }
 0x427   :  { %1912 = vst [vmem:[#allocation3 + $0x10] sm:$0xff] %v1856_v62  ;;  %v1859_v8 = vadd.f32 %v2072_v1, %v2008_v27  ;;  %v1850_v16 = vpop.f32.mrb[3].mxu0 }
 0x428   :  { %1910 = vst [vmem:[#allocation3] sm:$0xff] %v1848_v39  ;;  %v1851_v31 = vadd.f32 %v2008_v27, %v1850_v16  ;;  %v2079_v43 = vpop.f32.mrb[0].mxu1 }
 0x429   :  { %1913 = vst [vmem:[#allocation3 + $0x18] sm:$0xff] %v1859_v8  ;;  %v1888_v23 = vadd.f32 %v2079_v43, %v2008_v27  ;;  %v1879_v40 = vpop.f32.mrb[1].mxu1 }
 0x42a   :  { %1911 = vst [vmem:[#allocation3 + $0x8] sm:$0xff] %v1851_v31  ;;  %v1880_v15 = vadd.f32 %v2008_v27, %v1879_v40  ;;  %v2080_v4 = vpop.f32.mrb[2].mxu1 }
 0x42b   :  { %1920 = vst [vmem:[#allocation3 + $0x50] sm:$0xff] %v1888_v23  ;;  %v1891_v24 = vadd.f32 %v2080_v4, %v2008_v27  ;;  %v1882_v25 = vpop.f32.mrb[3].mxu1 }
 0x42c   :  { %1918 = vst [vmem:[#allocation3 + $0x40] sm:$0xff] %v1880_v15  ;;  %v1883_v20 = vadd.f32 %v2008_v27, %v1882_v25 }
 0x42d   :  { %1921 = vst [vmem:[#allocation3 + $0x58] sm:$0xff] %v1891_v24 }
 0x42e   :  { %1919 = vst [vmem:[#allocation3 + $0x48] sm:$0xff] %v1883_v20 }
 0x444   :  { %v2075_v50 = vpop.f32.mrb[4].mxu0 }
 0x445   :  { %v1872_v5 = vadd.f32 %v2075_v50, %v2008_v27  ;;  %v1863_v48 = vpop.f32.mrb[5].mxu0 }
 0x446   :  { %v1864_v45 = vadd.f32 %v2008_v27, %v1863_v48  ;;  %v2076_v2 = vpop.f32.mrb[6].mxu0 }
 0x447   :  { %1916 = vst [vmem:[#allocation3 + $0x30] sm:$0xff] %v1872_v5  ;;  %v1875_v59 = vadd.f32 %v2076_v2, %v2008_v27  ;;  %v1866_v41 = vpop.f32.mrb[7].mxu0 }
 0x448   :  { %1914 = vst [vmem:[#allocation3 + $0x20] sm:$0xff] %v1864_v45  ;;  %v1867_v53 = vadd.f32 %v2008_v27, %v1866_v41  ;;  %v2083_v49 = vpop.f32.mrb[4].mxu1 }
 0x449   :  { %1917 = vst [vmem:[#allocation3 + $0x38] sm:$0xff] %v1875_v59  ;;  %v1904_v18 = vadd.f32 %v2083_v49, %v2008_v27  ;;  %v1895_v37 = vpop.f32.mrb[5].mxu1 }
 0x44a   :  { %1915 = vst [vmem:[#allocation3 + $0x28] sm:$0xff] %v1867_v53  ;;  %v1896_v19 = vadd.f32 %v2008_v27, %v1895_v37  ;;  %v2084_v61 = vpop.f32.mrb[6].mxu1 }
 0x44b   :  { %1924 = vst [vmem:[#allocation3 + $0x70] sm:$0xff] %v1904_v18  ;;  %v1907_v14 = vadd.f32 %v2084_v61, %v2008_v27  ;;  %v1898_v57 = vpop.f32.mrb[7].mxu1 }
 0x44c   :  { %1922 = vst [vmem:[#allocation3 + $0x60] sm:$0xff] %v1896_v19  ;;  %v1899_v0 = vadd.f32 %v2008_v27, %v1898_v57 }
 0x44d   :  { %1925 = vst [vmem:[#allocation3 + $0x78] sm:$0xff] %v1907_v14 }
 0x44e   :  { %1923 = vst [vmem:[#allocation3 + $0x68] sm:$0xff] %v1899_v0 }
 0x44f   :  { %2322 = shalt.err (!%p2319_p4)
}
 0x450   :  { %s2323_s25 = scalar_lea.hbm %s3828_s5, 2048 }
 0x451   :  { %p2324_p5 = scmp.ne.s32.totalorder %s3828_s5, %s2323_s25  ;;  %p2327_p6 = scmp.lt.u32.totalorder %s2323_s25, %s3828_s5 }
 0x453   :  { %p2329_p7 = pnand %p2327_p6, %p2324_p5 }
 0x455   :  { %2332 = shalt.err (!%p2329_p7)
}
 0x456   :  { %s2339_s30 = smov 128  }
 0x457   :  { %1937 = dma.vmem_to_hbm [thread:$0]  %s1932_s21, 2048, %s3828_s5, [#allocation4], %s2339_s30, %s2339_s30, %s2337_s14  }
 0x458   :  { %2333 = dma.done.wait [#allocation4], 2048  }
 0x459   :  { %2334 = vsyncadd [#allocation4], 4294965248 }
 0x45a   :  { %1941 = vsyncpa [#allocation4], 1 }

</bundles_post_ra>
